<compile_context>
chip_gen: v7x
topology: tpu7x:2x2x1
jax: 0.10.0
libtpu: 0.0.40
codegen_flags: <defaults>
</compile_context>

<pallas_src>
import jax
import jax.numpy as jnp
from jax.experimental import pallas as pl
from jax.experimental.pallas import tpu as pltpu

# ----------------------------- model dimensions -----------------------------
B = 2          # number of graphs in the demo batch
N = 8          # nodes per graph
F_IN = 16      # input node feature size
HEADS = 4      # attention heads per layer
HID = 32       # per-head hidden size
FLAT = HEADS * HID          # 128, layer-1 output (flatten agg)
GNN_OUT = HID               # 32, layer-2 output (mean agg)
READ_OUT = 2 * GNN_OUT      # 64, WeightedSumAndMax output
PRED_HID = GNN_OUT // 2     # 16, predictor hidden

NEG_SLOPE = 0.2
NEG_INF = -1e30

# ------------------------ super-graph packing constants ----------------------
G_PACK = 2                  # graphs per grid step (demo); ~16 on v5e, ~32 on v6e/v7x
GN = G_PACK * N             # packed nodes per step
HN = HEADS * GN             # lane-stacked head*src axis
IN_W = -(-(F_IN + HN) // 128) * 128        # fused [h | adj] slab width (lane-dense)
PB_W = max(2 * FLAT, 2 * HN, FLAT + HN)    # bf16 param-slab width


def _r8(x):  return ((x + 7) // 8) * 8
def _r16(x): return ((x + 15) // 16) * 16


# ------------------- packed parameter slab row offsets ----------------------
# pbig: (NB_ROWS, PB_W) bf16 — GNN weights + attention / layout constants
RB_WFR1 = 0                          # [W1 | Wr1]            (F_IN rows)
RB_WFR2 = _r16(RB_WFR1 + F_IN)       # [W2 | Wr2]            (FLAT rows)
RB_AT1 = _r16(RB_WFR2 + FLAT)        # [al1rep | ar1rep]     (FLAT rows, cols 0:2*HN)
RB_AT2 = _r16(RB_AT1 + FLAT)         # [al2rep | ar2rep]
RB_BD = _r16(RB_AT2 + FLAT)          # cols 0:FLAT bd, cols FLAT:FLAT+HN bsum (HN rows)
RB_DSEL = _r16(RB_BD + HN)           # cols 0:HN dsel        (GN rows)
RB_REP = _r16(RB_DSEL + GN)          # cols 0:GN rep         (HN rows)
NB_ROWS = _r16(RB_REP + HN)

# phead: (NH_ROWS, FLAT) f32 — readout/predictor weights, biases, segment map
RH_WP1A = 0        # rows 0:32,  cols 0:PRED_HID = Wp1[:GNN_OUT]
RH_WP1B = 32       # rows 32:64, cols 0:PRED_HID = Wp1[GNN_OUT:]
RH_WP2 = 64        # rows 64:80, col 0 = Wp2
RH_BP1 = 80        # cols 0:PRED_HID = bp1
RH_BP2 = 88        # col 0 = bp2
RH_WG = 96         # cols 0:GNN_OUT = Wg
RH_BG = 104        # col 0 = bg
RH_B1 = 112        # GATConv1 bias (FLAT lanes)
RH_B2 = 120        # GATConv2 bias
RH_SEG = 128       # (G_PACK, GN) graph-segment selector
NH_ROWS = _r8(RH_SEG + G_PACK)


# --------------------------------- kernel -----------------------------------
def gat_forward_kernel(xin_ref, pbig_ref, phead_ref, out_ref):
    f32 = jnp.float32
    bf16 = jnp.bfloat16

    xin = xin_ref[...]                                    # (GN, IN_W) bf16
    hg = xin[:, :F_IN]                                    # (GN, F_IN) bf16
    adjr = xin[:, F_IN:F_IN + HN]                         # (GN, HN)   bf16 0/1

    # layout / softmax helper constants (loaded once per grid step)
    bd = pbig_ref[RB_BD:RB_BD + HN, 0:FLAT].astype(f32)          # (HN, FLAT) block-diag 0/1
    bsum = pbig_ref[RB_BD:RB_BD + HN, FLAT:FLAT + HN]            # (HN, HN)   block-diag ones
    dsel = pbig_ref[RB_DSEL:RB_DSEL + GN, 0:HN].astype(f32)      # (GN, HN)   per-block identity
    rep = pbig_ref[RB_REP:RB_REP + HN, 0:GN]                     # (HN, GN)   head replication

    def gat_layer(x_bf16, wfr, alar, bias_f32):
        # fused fc + res_fc projection (bf16 operands, f32 accumulation)
        zr = jnp.dot(x_bf16, wfr, preferred_element_type=f32)     # (GN, 2*FLAT)
        z, res = zr[:, :FLAT], zr[:, FLAT:]
        zb = z.astype(bf16)
        # single merged attention-logit matmul, all heads lane-stacked
        att = jnp.dot(zb, alar, preferred_element_type=f32)       # (GN, 2*HN)
        el_rows, er_rows = att[:, :HN], att[:, HN:]                # el_k[v] / er_k[v]
        s_el = jnp.sum(el_rows * dsel, axis=0, keepdims=True)      # (1, HN): el_k[u]
        s = er_rows + s_el                                          # s[v, k*GN+u]
        s = jnp.where(s > 0.0, s, NEG_SLOPE * s)                    # LeakyReLU
        s = jnp.where(adjr > 0.0, s, NEG_INF)                       # mask non-edges
        # per-dst-row max over all heads/srcs: valid per-group stabilizer, NaN-proof
        m = jnp.max(s, axis=-1, keepdims=True)                      # (GN, 1)
        p = jnp.exp(s - m)                                          # (GN, HN)
        den = jnp.dot(p.astype(bf16), bsum, preferred_element_type=f32)  # group sums
        a = p * pl.reciprocal(den, approx=True)                     # softmax weights
        # replicate z per head via MXU + block-diag mask, aggregate all heads at once
        zbd = (jnp.dot(rep, zb, preferred_element_type=f32) * bd).astype(bf16)   # (HN, FLAT)
        rflat = jnp.dot(a.astype(bf16), zbd, preferred_element_type=f32)          # (GN, FLAT)
        return rflat + res + bias_f32                               # head-major "flatten"

    # ---- GAT layer 1: flatten aggregation + ELU ----
    wfr1 = pbig_ref[RB_WFR1:RB_WFR1 + F_IN, 0:2 * FLAT]
    alar1 = pbig_ref[RB_AT1:RB_AT1 + FLAT, 0:2 * HN]
    b1 = phead_ref[RH_B1:RH_B1 + 1, :]
    x1 = gat_layer(hg, wfr1, alar1, b1)
    h1 = jnp.where(x1 > 0.0, x1, jnp.exp(x1) - 1.0)                 # ELU, (GN, FLAT)

    # ---- GAT layer 2: mean-over-heads aggregation, no activation ----
    wfr2 = pbig_ref[RB_WFR2:RB_WFR2 + FLAT, 0:2 * FLAT]
    alar2 = pbig_ref[RB_AT2:RB_AT2 + FLAT, 0:2 * HN]
    b2 = phead_ref[RH_B2:RH_B2 + 1, :]
    x2 = gat_layer(h1.astype(bf16), wfr2, alar2, b2)
    h2 = 0.25 * (x2[:, 0:HID] + x2[:, HID:2 * HID]
                 + x2[:, 2 * HID:3 * HID] + x2[:, 3 * HID:4 * HID])  # (GN, 32)

    # ---- WeightedSumAndMax readout: per-graph segmented (packed graphs) ----
    wg = phead_ref[RH_WG:RH_WG + 1, 0:GNN_OUT]                      # (1, 32)
    bg = phead_ref[RH_BG:RH_BG + 1, 0:1]                            # (1, 1)
    glog = jnp.sum(h2 * wg, axis=-1, keepdims=True) + bg            # (GN, 1)
    w = jax.nn.sigmoid(glog)
    seg = phead_ref[RH_SEG:RH_SEG + G_PACK, 0:GN]                   # (G, GN) 0/1 selector
    hsum = jnp.dot(seg, w * h2, preferred_element_type=f32)         # (G, 32) segment sums
    hmax = jnp.concatenate(
        [jnp.max(h2[g * N:(g + 1) * N, :], axis=0, keepdims=True)
         for g in range(G_PACK)], axis=0)                            # (G, 32) segment max

    # ---- predictor MLP: Linear -> ReLU -> Linear (lane-padded to 128) ----
    wp1a = phead_ref[RH_WP1A:RH_WP1A + GNN_OUT, :]                  # (32, 128)
    wp1b = phead_ref[RH_WP1B:RH_WP1B + GNN_OUT, :]                  # (32, 128)
    bp1 = phead_ref[RH_BP1:RH_BP1 + 1, :]                           # (1, 128)
    p1 = (jnp.dot(hsum, wp1a, preferred_element_type=f32)
          + jnp.dot(hmax, wp1b, preferred_element_type=f32) + bp1)
    p1 = jnp.maximum(p1, 0.0)                                        # (G, 128)
    wp2 = phead_ref[RH_WP2:RH_WP2 + PRED_HID, :]                     # (16, 128)
    bp2 = phead_ref[RH_BP2:RH_BP2 + 1, :]                            # (1, 128)
    out = jnp.dot(p1[:, :PRED_HID], wp2,
                  preferred_element_type=f32) + bp2                  # (G, 128), col 0 valid
    out_ref[0] = out


# ------------------- wrapper-side param packing (done ONCE) ------------------
def pack_params(params):
    f32 = jnp.float32
    eye_k = jnp.eye(HEADS, dtype=f32)

    def attn_rep(a):  # (HEADS, HID) -> (FLAT, HN) block matrix replicated over src lanes
        blk = (a[:, :, None] * eye_k[:, None, :]).reshape(FLAT, HEADS)
        rep = jnp.repeat(eye_k, GN, axis=1)               # (K, K*GN)
        return blk @ rep                                   # (FLAT, HN)

    al1r, ar1r = attn_rep(params["al1"]), attn_rep(params["ar1"])
    al2r, ar2r = attn_rep(params["al2"]), attn_rep(params["ar2"])
    bd = jnp.kron(eye_k, jnp.ones((GN, HID), f32))         # (HN, FLAT)
    bsum = jnp.kron(eye_k, jnp.ones((GN, GN), f32))        # (HN, HN)
    dsel = jnp.tile(jnp.eye(GN, dtype=f32), (1, HEADS))    # (GN, HN)
    rep = jnp.tile(jnp.eye(GN, dtype=f32), (HEADS, 1))     # (HN, GN)

    pbig = jnp.zeros((NB_ROWS, PB_W), f32)
    pbig = pbig.at[RB_WFR1:RB_WFR1 + F_IN, :FLAT].set(params["W1"])
    pbig = pbig.at[RB_WFR1:RB_WFR1 + F_IN, FLAT:2 * FLAT].set(params["Wr1"])
    pbig = pbig.at[RB_WFR2:RB_WFR2 + FLAT, :FLAT].set(params["W2"])
    pbig = pbig.at[RB_WFR2:RB_WFR2 + FLAT, FLAT:2 * FLAT].set(params["Wr2"])
    pbig = pbig.at[RB_AT1:RB_AT1 + FLAT, :HN].set(al1r)
    pbig = pbig.at[RB_AT1:RB_AT1 + FLAT, HN:2 * HN].set(ar1r)
    pbig = pbig.at[RB_AT2:RB_AT2 + FLAT, :HN].set(al2r)
    pbig = pbig.at[RB_AT2:RB_AT2 + FLAT, HN:2 * HN].set(ar2r)
    pbig = pbig.at[RB_BD:RB_BD + HN, :FLAT].set(bd)
    pbig = pbig.at[RB_BD:RB_BD + HN, FLAT:FLAT + HN].set(bsum)
    pbig = pbig.at[RB_DSEL:RB_DSEL + GN, :HN].set(dsel)
    pbig = pbig.at[RB_REP:RB_REP + HN, :GN].set(rep)
    pbig = pbig.astype(jnp.bfloat16)                       # bf16 MXU operands

    phead = jnp.zeros((NH_ROWS, FLAT), f32)                # precision-sensitive stays f32
    phead = phead.at[RH_WP1A:RH_WP1A + GNN_OUT, :PRED_HID].set(params["Wp1"][:GNN_OUT])
    phead = phead.at[RH_WP1B:RH_WP1B + GNN_OUT, :PRED_HID].set(params["Wp1"][GNN_OUT:])
    phead = phead.at[RH_WP2:RH_WP2 + PRED_HID, 0].set(params["Wp2"][:, 0])
    phead = phead.at[RH_BP1, :PRED_HID].set(params["bp1"][0])
    phead = phead.at[RH_BP2, 0].set(params["bp2"][0, 0])
    phead = phead.at[RH_WG, :GNN_OUT].set(params["Wg"][:, 0])
    phead = phead.at[RH_BG, 0].set(params["bg"][0, 0])
    phead = phead.at[RH_B1, :FLAT].set(params["b1"][0])
    phead = phead.at[RH_B2, :FLAT].set(params["b2"][0])
    seg = jnp.kron(jnp.eye(G_PACK, dtype=f32), jnp.ones((1, N), f32))
    phead = phead.at[RH_SEG:RH_SEG + G_PACK, :GN].set(seg)
    return pbig, phead


# --------------------------------- wrapper ----------------------------------
@jax.jit
def gat_forward(h, adj, pbig, phead):
    batch = h.shape[0]
    steps = (batch + G_PACK - 1) // G_PACK
    b_pad = steps * G_PACK

    # pad to a multiple of G_PACK graphs: zero features, self-loop-only adjacency
    if b_pad != batch:
        h = jnp.concatenate(
            [h, jnp.zeros((b_pad - batch, N, F_IN), h.dtype)], axis=0)
        eye = jnp.broadcast_to(jnp.eye(N, dtype=adj.dtype),
                               (b_pad - batch, N, N))
        adj = jnp.concatenate([adj, eye], axis=0)

    # block-diagonal packed adjacency per step, lane-tiled over heads
    adj_s = adj.reshape(steps, G_PACK, N, N)
    adjp = jnp.zeros((steps, GN, GN), adj.dtype)
    for g in range(G_PACK):
        adjp = adjp.at[:, g * N:(g + 1) * N, g * N:(g + 1) * N].set(adj_s[:, g])
    adjr = jnp.tile(adjp, (1, 1, HEADS)).reshape(steps * GN, HN)

    # fused lane-dense per-step input slab: [h | adjacency | pad] in bf16
    hflat = h.reshape(steps * GN, F_IN)
    pieces = [hflat, adjr]
    pad_w = IN_W - (F_IN + HN)
    if pad_w > 0:
        pieces.append(jnp.zeros((steps * GN, pad_w), hflat.dtype))
    xin = jnp.concatenate(pieces, axis=1).astype(jnp.bfloat16)

    out = pl.pallas_call(
        gat_forward_kernel,
        out_shape=jax.ShapeDtypeStruct((steps, G_PACK, FLAT), jnp.float32),
        grid=(steps,),
        in_specs=[
            pl.BlockSpec((GN, IN_W), lambda i: (i, 0)),
            pl.BlockSpec((NB_ROWS, PB_W), lambda i: (0, 0)),   # constant -> fetched once
            pl.BlockSpec((NH_ROWS, FLAT), lambda i: (0, 0)),   # constant -> fetched once
        ],
        out_specs=pl.BlockSpec((1, G_PACK, FLAT), lambda i: (i, 0, 0)),
        compiler_params=pltpu.CompilerParams(
            dimension_semantics=("parallel",)),
    )(xin, pbig, phead)
    return out.reshape(b_pad, FLAT)[:batch, :1]


# -------------------------- pure-JAX reference -------------------------------
def _gat_layer_ref(h, adj_ds, W, Wres, attn_l, attn_r, bias,
                   num_heads, out_per_head, agg, apply_elu):
    z = h @ W
    res = h @ Wres
    head_outs = []
    for k in range(num_heads):
        sl = slice(k * out_per_head, (k + 1) * out_per_head)
        zk = z[:, sl]
        el = jnp.sum(zk * attn_l[k:k + 1, :], axis=-1, keepdims=True)
        er = jnp.sum(zk * attn_r[k:k + 1, :], axis=-1, keepdims=True)
        e = er + el.T
        e = jnp.where(e > 0, e, NEG_SLOPE * e)
        e = jnp.where(adj_ds > 0, e, NEG_INF)
        e = e - jnp.max(e, axis=-1, keepdims=True)
        p = jnp.exp(e)
        a = p / jnp.sum(p, axis=-1, keepdims=True)
        rk = a @ zk + res[:, sl] + bias[:, sl]
        if apply_elu:
            rk = jnp.where(rk > 0.0, rk, jnp.exp(rk) - 1.0)
        head_outs.append(rk)
    if agg == "flatten":
        return jnp.concatenate(head_outs, axis=-1)
    acc = head_outs[0]
    for hk in head_outs[1:]:
        acc = acc + hk
    return acc * (1.0 / num_heads)


def gat_reference(h, adj, params):
    outs = []
    for b in range(h.shape[0]):
        h1 = _gat_layer_ref(h[b], adj[b], params["W1"], params["Wr1"],
                            params["al1"], params["ar1"], params["b1"],
                            HEADS, HID, "flatten", True)
        h2 = _gat_layer_ref(h1, adj[b], params["W2"], params["Wr2"],
                            params["al2"], params["ar2"], params["b2"],
                            HEADS, HID, "mean", False)
        w = jax.nn.sigmoid(h2 @ params["Wg"] + params["bg"])
        gfeat = jnp.concatenate(
            [jnp.sum(w * h2, axis=0, keepdims=True),
             jnp.max(h2, axis=0, keepdims=True)], axis=-1)
        p = jnp.maximum(gfeat @ params["Wp1"] + params["bp1"], 0.0)
        p = p @ params["Wp2"] + params["bp2"]
        outs.append(p[0])
    return jnp.stack(outs)


# ----------------------------- param / data init -----------------------------
def init_params(key):
    ks = jax.random.split(key, 16)
    s = 0.1

    def rnd(k, shape):
        return jax.random.normal(k, shape, dtype=jnp.float32) * s

    return {
        "W1": rnd(ks[0], (F_IN, FLAT)),      # GATConv1 fc
        "Wr1": rnd(ks[1], (F_IN, FLAT)),     # GATConv1 res_fc
        "al1": rnd(ks[2], (HEADS, HID)),     # GATConv1 attn_l
        "ar1": rnd(ks[3], (HEADS, HID)),     # GATConv1 attn_r
        "b1": rnd(ks[4], (1, FLAT)),         # GATConv1 bias
        "W2": rnd(ks[5], (FLAT, FLAT)),      # GATConv2 fc
        "Wr2": rnd(ks[6], (FLAT, FLAT)),     # GATConv2 res_fc
        "al2": rnd(ks[7], (HEADS, HID)),
        "ar2": rnd(ks[8], (HEADS, HID)),
        "b2": rnd(ks[9], (1, FLAT)),
        "Wg": rnd(ks[10], (GNN_OUT, 1)),     # atom weighting (sigmoid gate)
        "bg": rnd(ks[11], (1, 1)),
        "Wp1": rnd(ks[12], (READ_OUT, PRED_HID)),
        "bp1": rnd(ks[13], (1, PRED_HID)),
        "Wp2": rnd(ks[14], (PRED_HID, 1)),
        "bp2": rnd(ks[15], (1, 1)),
    }


def make_inputs(key):
    hk, ak = jax.random.split(key)
    h = jax.random.normal(hk, (B, N, F_IN), dtype=jnp.float32)
    # symmetric random adjacency with self-loops; stored as (dst, src)
    u = jax.random.uniform(ak, (B, N, N)) < 0.4
    adj = jnp.logical_or(u, jnp.transpose(u, (0, 2, 1)))
    adj = jnp.logical_or(adj, jnp.eye(N, dtype=bool)[None, :, :])
    return h, adj.astype(jnp.float32)


# ----------------------------------- main ------------------------------------
if __name__ == "__main__":
    key = jax.random.PRNGKey(0)
    pkey, dkey = jax.random.split(key)
    params = init_params(pkey)
    h, adj = make_inputs(dkey)

    # Param slabs packed ONCE at "model load" (hoisted out of the per-call path).
    pbig, phead = pack_params(params)
    pbig = jax.block_until_ready(pbig)
    phead = jax.block_until_ready(phead)

    out = gat_forward(h, adj, pbig, phead)
    out = jax.block_until_ready(out)

    ref = gat_reference(h, adj, params)
    assert out.shape == (B, 1), out.shape
    # bf16 MXU operands in the GNN path -> relaxed tolerance vs f32 reference
    assert bool(jnp.allclose(out, ref, rtol=2e-2, atol=2e-2)), (out, ref)

    print("KERNEL_OK")
</pallas_src>

<mosaic_0001>
module attributes {stable_mosaic.version = 11 : i64} {
  func.func @gat_forward_kernel(%arg0: i32, %arg1: memref<16x128xbf16, #tpu.memory_space<vmem>>, %arg2: memref<544x256xbf16, #tpu.memory_space<vmem>>, %arg3: memref<136x128xf32, #tpu.memory_space<vmem>>, %arg4: memref<1x2x128xf32, #tpu.memory_space<vmem>>) attributes {dimension_semantics = [#tpu.dimension_semantics<parallel>], iteration_bounds = array<i64: 1>, scalar_prefetch = 0 : i64, scratch_operands = 0 : i64, tpu.core_type = #tpu.core_type<tc>, window_params = [{transform_indices = @transform_0, window_bounds = array<i64: 16, 128>}, {pipeline_mode = #tpu.pipeline_mode<synchronous>, transform_indices = @transform_1, window_bounds = array<i64: 544, 256>}, {pipeline_mode = #tpu.pipeline_mode<synchronous>, transform_indices = @transform_2, window_bounds = array<i64: 136, 128>}, {transform_indices = @transform_3, window_bounds = array<i64: 1, 2, 128>}]} {
    %c0 = arith.constant 0 : index
    %c0_0 = arith.constant 0 : index
    %0 = vector.load %arg1[%c0, %c0_0] : memref<16x128xbf16, #tpu.memory_space<vmem>>, vector<16x128xbf16>
    %1 = vector.extract_strided_slice %0 {offsets = [0, 0], sizes = [16, 16], strides = [1, 1]} : vector<16x128xbf16> to vector<16x16xbf16>
    %2 = vector.extract_strided_slice %0 {offsets = [0, 16], sizes = [16, 64], strides = [1, 1]} : vector<16x128xbf16> to vector<16x64xbf16>
    %c400 = arith.constant 400 : index
    %c0_1 = arith.constant 0 : index
    %3 = vector.load %arg2[%c400, %c0_1] : memref<544x256xbf16, #tpu.memory_space<vmem>>, vector<64x128xbf16>
    %4 = arith.extf %3 : vector<64x128xbf16> to vector<64x128xf32>
    %c400_2 = arith.constant 400 : index
    %c128 = arith.constant 128 : index
    %5 = vector.load %arg2[%c400_2, %c128] : memref<544x256xbf16, #tpu.memory_space<vmem>>, vector<64x64xbf16>
    %c464 = arith.constant 464 : index
    %c0_3 = arith.constant 0 : index
    %6 = vector.load %arg2[%c464, %c0_3] : memref<544x256xbf16, #tpu.memory_space<vmem>>, vector<16x64xbf16>
    %7 = arith.extf %6 : vector<16x64xbf16> to vector<16x64xf32>
    %c480 = arith.constant 480 : index
    %c0_4 = arith.constant 0 : index
    %8 = vector.load %arg2[%c480, %c0_4] : memref<544x256xbf16, #tpu.memory_space<vmem>>, vector<64x16xbf16>
    %c0_5 = arith.constant 0 : index
    %c0_6 = arith.constant 0 : index
    %9 = vector.load %arg2[%c0_5, %c0_6] : memref<544x256xbf16, #tpu.memory_space<vmem>>, vector<16x256xbf16>
    %c144 = arith.constant 144 : index
    %c0_7 = arith.constant 0 : index
    %10 = vector.load %arg2[%c144, %c0_7] : memref<544x256xbf16, #tpu.memory_space<vmem>>, vector<128x128xbf16>
    %c112 = arith.constant 112 : index
    %c0_8 = arith.constant 0 : index
    %11 = vector.load %arg3[%c112, %c0_8] : memref<136x128xf32, #tpu.memory_space<vmem>>, vector<1x128xf32>
    %cst = arith.constant dense<0.000000e+00> : vector<16x256xf32>
    %12 = tpu.matmul %1, %9, %cst {dimension_numbers = #tpu.dot_dimension_numbers<[1], [0], [0], [1], [0, 0, 1, 1], [], []>} : vector<16x16xbf16>, vector<16x256xbf16>, vector<16x256xf32> -> vector<16x256xf32>
    %13 = vector.extract_strided_slice %12 {offsets = [0, 0], sizes = [16, 128], strides = [1, 1]} : vector<16x256xf32> to vector<16x128xf32>
    %14 = vector.extract_strided_slice %12 {offsets = [0, 128], sizes = [16, 128], strides = [1, 1]} : vector<16x256xf32> to vector<16x128xf32>
    %15 = arith.truncf %13 : vector<16x128xf32> to vector<16x128xbf16>
    %cst_9 = arith.constant dense<0.000000e+00> : vector<16x128xf32>
    %16 = tpu.matmul %15, %10, %cst_9 {dimension_numbers = #tpu.dot_dimension_numbers<[1], [0], [0], [1], [0, 0, 1, 1], [], []>} : vector<16x128xbf16>, vector<128x128xbf16>, vector<16x128xf32> -> vector<16x128xf32>
    %17 = vector.extract_strided_slice %16 {offsets = [0, 0], sizes = [16, 64], strides = [1, 1]} : vector<16x128xf32> to vector<16x64xf32>
    %18 = vector.extract_strided_slice %16 {offsets = [0, 64], sizes = [16, 64], strides = [1, 1]} : vector<16x128xf32> to vector<16x64xf32>
    %19 = arith.mulf %17, %7 : vector<16x64xf32>
    %cst_10 = arith.constant dense<0.000000e+00> : vector<64xf32>
    %20 = vector.multi_reduction <add>, %19, %cst_10 [0] : vector<16x64xf32> to vector<64xf32>
    %21 = vector.shape_cast %20 : vector<64xf32> to vector<1x64xf32>
    %22 = vector.broadcast %21 : vector<1x64xf32> to vector<16x64xf32>
    %23 = arith.addf %18, %22 : vector<16x64xf32>
    %cst_11 = arith.constant 0.000000e+00 : f32
    %24 = vector.broadcast %cst_11 : f32 to vector<16x64xf32>
    %25 = arith.cmpf ogt, %23, %24 : vector<16x64xf32>
    %cst_12 = arith.constant 2.000000e-01 : f32
    %26 = vector.broadcast %cst_12 : f32 to vector<16x64xf32>
    %27 = arith.mulf %26, %23 : vector<16x64xf32>
    %28 = arith.select %25, %23, %27 : vector<16x64xi1>, vector<16x64xf32>
    %cst_13 = arith.constant 0.000000e+00 : bf16
    %29 = vector.broadcast %cst_13 : bf16 to vector<16x64xbf16>
    %30 = arith.cmpf ogt, %2, %29 : vector<16x64xbf16>
    %cst_14 = arith.constant -1.000000e+30 : f32
    %31 = vector.broadcast %cst_14 : f32 to vector<16x64xf32>
    %32 = arith.select %30, %28, %31 : vector<16x64xi1>, vector<16x64xf32>
    %cst_15 = arith.constant dense<0xFF800000> : vector<16xf32>
    %33 = vector.multi_reduction <maximumf>, %32, %cst_15 [1] : vector<16x64xf32> to vector<16xf32>
    %34 = vector.shape_cast %33 : vector<16xf32> to vector<16x1xf32>
    %35 = vector.broadcast %34 : vector<16x1xf32> to vector<16x64xf32>
    %36 = arith.subf %32, %35 : vector<16x64xf32>
    %37 = math.exp %36 : vector<16x64xf32>
    %38 = arith.truncf %37 : vector<16x64xf32> to vector<16x64xbf16>
    %cst_16 = arith.constant dense<0.000000e+00> : vector<16x64xf32>
    %39 = tpu.matmul %38, %5, %cst_16 {dimension_numbers = #tpu.dot_dimension_numbers<[1], [0], [0], [1], [0, 0, 1, 1], [], []>} : vector<16x64xbf16>, vector<64x64xbf16>, vector<16x64xf32> -> vector<16x64xf32>
    %40 = tpu.reciprocal %39 {approx = true} : vector<16x64xf32> -> vector<16x64xf32>
    %41 = arith.mulf %37, %40 : vector<16x64xf32>
    %cst_17 = arith.constant dense<0.000000e+00> : vector<64x128xf32>
    %42 = tpu.matmul %8, %15, %cst_17 {dimension_numbers = #tpu.dot_dimension_numbers<[1], [0], [0], [1], [0, 0, 1, 1], [], []>} : vector<64x16xbf16>, vector<16x128xbf16>, vector<64x128xf32> -> vector<64x128xf32>
    %43 = arith.mulf %42, %4 : vector<64x128xf32>
    %44 = arith.truncf %43 : vector<64x128xf32> to vector<64x128xbf16>
    %45 = arith.truncf %41 : vector<16x64xf32> to vector<16x64xbf16>
    %cst_18 = arith.constant dense<0.000000e+00> : vector<16x128xf32>
    %46 = tpu.matmul %45, %44, %cst_18 {dimension_numbers = #tpu.dot_dimension_numbers<[1], [0], [0], [1], [0, 0, 1, 1], [], []>} : vector<16x64xbf16>, vector<64x128xbf16>, vector<16x128xf32> -> vector<16x128xf32>
    %47 = arith.addf %46, %14 : vector<16x128xf32>
    %48 = vector.broadcast %11 : vector<1x128xf32> to vector<16x128xf32>
    %49 = arith.addf %47, %48 : vector<16x128xf32>
    %cst_19 = arith.constant 0.000000e+00 : f32
    %50 = vector.broadcast %cst_19 : f32 to vector<16x128xf32>
    %51 = arith.cmpf ogt, %49, %50 : vector<16x128xf32>
    %52 = math.exp %49 : vector<16x128xf32>
    %cst_20 = arith.constant 1.000000e+00 : f32
    %53 = vector.broadcast %cst_20 : f32 to vector<16x128xf32>
    %54 = arith.subf %52, %53 : vector<16x128xf32>
    %55 = arith.select %51, %49, %54 : vector<16x128xi1>, vector<16x128xf32>
    %c16 = arith.constant 16 : index
    %c0_21 = arith.constant 0 : index
    %56 = vector.load %arg2[%c16, %c0_21] : memref<544x256xbf16, #tpu.memory_space<vmem>>, vector<128x256xbf16>
    %c272 = arith.constant 272 : index
    %c0_22 = arith.constant 0 : index
    %57 = vector.load %arg2[%c272, %c0_22] : memref<544x256xbf16, #tpu.memory_space<vmem>>, vector<128x128xbf16>
    %c120 = arith.constant 120 : index
    %c0_23 = arith.constant 0 : index
    %58 = vector.load %arg3[%c120, %c0_23] : memref<136x128xf32, #tpu.memory_space<vmem>>, vector<1x128xf32>
    %59 = arith.truncf %55 : vector<16x128xf32> to vector<16x128xbf16>
    %cst_24 = arith.constant dense<0.000000e+00> : vector<16x256xf32>
    %60 = tpu.matmul %59, %56, %cst_24 {dimension_numbers = #tpu.dot_dimension_numbers<[1], [0], [0], [1], [0, 0, 1, 1], [], []>} : vector<16x128xbf16>, vector<128x256xbf16>, vector<16x256xf32> -> vector<16x256xf32>
    %61 = vector.extract_strided_slice %60 {offsets = [0, 0], sizes = [16, 128], strides = [1, 1]} : vector<16x256xf32> to vector<16x128xf32>
    %62 = vector.extract_strided_slice %60 {offsets = [0, 128], sizes = [16, 128], strides = [1, 1]} : vector<16x256xf32> to vector<16x128xf32>
    %63 = arith.truncf %61 : vector<16x128xf32> to vector<16x128xbf16>
    %cst_25 = arith.constant dense<0.000000e+00> : vector<16x128xf32>
    %64 = tpu.matmul %63, %57, %cst_25 {dimension_numbers = #tpu.dot_dimension_numbers<[1], [0], [0], [1], [0, 0, 1, 1], [], []>} : vector<16x128xbf16>, vector<128x128xbf16>, vector<16x128xf32> -> vector<16x128xf32>
    %65 = vector.extract_strided_slice %64 {offsets = [0, 0], sizes = [16, 64], strides = [1, 1]} : vector<16x128xf32> to vector<16x64xf32>
    %66 = vector.extract_strided_slice %64 {offsets = [0, 64], sizes = [16, 64], strides = [1, 1]} : vector<16x128xf32> to vector<16x64xf32>
    %67 = arith.mulf %65, %7 : vector<16x64xf32>
    %cst_26 = arith.constant dense<0.000000e+00> : vector<64xf32>
    %68 = vector.multi_reduction <add>, %67, %cst_26 [0] : vector<16x64xf32> to vector<64xf32>
    %69 = vector.shape_cast %68 : vector<64xf32> to vector<1x64xf32>
    %70 = vector.broadcast %69 : vector<1x64xf32> to vector<16x64xf32>
    %71 = arith.addf %66, %70 : vector<16x64xf32>
    %cst_27 = arith.constant 0.000000e+00 : f32
    %72 = vector.broadcast %cst_27 : f32 to vector<16x64xf32>
    %73 = arith.cmpf ogt, %71, %72 : vector<16x64xf32>
    %cst_28 = arith.constant 2.000000e-01 : f32
    %74 = vector.broadcast %cst_28 : f32 to vector<16x64xf32>
    %75 = arith.mulf %74, %71 : vector<16x64xf32>
    %76 = arith.select %73, %71, %75 : vector<16x64xi1>, vector<16x64xf32>
    %cst_29 = arith.constant 0.000000e+00 : bf16
    %77 = vector.broadcast %cst_29 : bf16 to vector<16x64xbf16>
    %78 = arith.cmpf ogt, %2, %77 : vector<16x64xbf16>
    %cst_30 = arith.constant -1.000000e+30 : f32
    %79 = vector.broadcast %cst_30 : f32 to vector<16x64xf32>
    %80 = arith.select %78, %76, %79 : vector<16x64xi1>, vector<16x64xf32>
    %cst_31 = arith.constant dense<0xFF800000> : vector<16xf32>
    %81 = vector.multi_reduction <maximumf>, %80, %cst_31 [1] : vector<16x64xf32> to vector<16xf32>
    %82 = vector.shape_cast %81 : vector<16xf32> to vector<16x1xf32>
    %83 = vector.broadcast %82 : vector<16x1xf32> to vector<16x64xf32>
    %84 = arith.subf %80, %83 : vector<16x64xf32>
    %85 = math.exp %84 : vector<16x64xf32>
    %86 = arith.truncf %85 : vector<16x64xf32> to vector<16x64xbf16>
    %cst_32 = arith.constant dense<0.000000e+00> : vector<16x64xf32>
    %87 = tpu.matmul %86, %5, %cst_32 {dimension_numbers = #tpu.dot_dimension_numbers<[1], [0], [0], [1], [0, 0, 1, 1], [], []>} : vector<16x64xbf16>, vector<64x64xbf16>, vector<16x64xf32> -> vector<16x64xf32>
    %88 = tpu.reciprocal %87 {approx = true} : vector<16x64xf32> -> vector<16x64xf32>
    %89 = arith.mulf %85, %88 : vector<16x64xf32>
    %cst_33 = arith.constant dense<0.000000e+00> : vector<64x128xf32>
    %90 = tpu.matmul %8, %63, %cst_33 {dimension_numbers = #tpu.dot_dimension_numbers<[1], [0], [0], [1], [0, 0, 1, 1], [], []>} : vector<64x16xbf16>, vector<16x128xbf16>, vector<64x128xf32> -> vector<64x128xf32>
    %91 = arith.mulf %90, %4 : vector<64x128xf32>
    %92 = arith.truncf %91 : vector<64x128xf32> to vector<64x128xbf16>
    %93 = arith.truncf %89 : vector<16x64xf32> to vector<16x64xbf16>
    %cst_34 = arith.constant dense<0.000000e+00> : vector<16x128xf32>
    %94 = tpu.matmul %93, %92, %cst_34 {dimension_numbers = #tpu.dot_dimension_numbers<[1], [0], [0], [1], [0, 0, 1, 1], [], []>} : vector<16x64xbf16>, vector<64x128xbf16>, vector<16x128xf32> -> vector<16x128xf32>
    %95 = arith.addf %94, %62 : vector<16x128xf32>
    %96 = vector.broadcast %58 : vector<1x128xf32> to vector<16x128xf32>
    %97 = arith.addf %95, %96 : vector<16x128xf32>
    %98 = vector.extract_strided_slice %97 {offsets = [0, 0], sizes = [16, 32], strides = [1, 1]} : vector<16x128xf32> to vector<16x32xf32>
    %99 = vector.extract_strided_slice %97 {offsets = [0, 32], sizes = [16, 32], strides = [1, 1]} : vector<16x128xf32> to vector<16x32xf32>
    %100 = arith.addf %98, %99 : vector<16x32xf32>
    %101 = vector.extract_strided_slice %97 {offsets = [0, 64], sizes = [16, 32], strides = [1, 1]} : vector<16x128xf32> to vector<16x32xf32>
    %102 = arith.addf %100, %101 : vector<16x32xf32>
    %103 = vector.extract_strided_slice %97 {offsets = [0, 96], sizes = [16, 32], strides = [1, 1]} : vector<16x128xf32> to vector<16x32xf32>
    %104 = arith.addf %102, %103 : vector<16x32xf32>
    %cst_35 = arith.constant 2.500000e-01 : f32
    %105 = vector.broadcast %cst_35 : f32 to vector<16x32xf32>
    %106 = arith.mulf %105, %104 : vector<16x32xf32>
    %c96 = arith.constant 96 : index
    %c0_36 = arith.constant 0 : index
    %107 = vector.load %arg3[%c96, %c0_36] : memref<136x128xf32, #tpu.memory_space<vmem>>, vector<1x32xf32>
    %c104 = arith.constant 104 : index
    %c0_37 = arith.constant 0 : index
    %108 = vector.load %arg3[%c104, %c0_37] : memref<136x128xf32, #tpu.memory_space<vmem>>, vector<1x1xf32>
    %109 = vector.broadcast %107 : vector<1x32xf32> to vector<16x32xf32>
    %110 = arith.mulf %106, %109 : vector<16x32xf32>
    %cst_38 = arith.constant dense<0.000000e+00> : vector<16xf32>
    %111 = vector.multi_reduction <add>, %110, %cst_38 [1] : vector<16x32xf32> to vector<16xf32>
    %112 = vector.shape_cast %111 : vector<16xf32> to vector<16x1xf32>
    %113 = vector.broadcast %108 : vector<1x1xf32> to vector<16x1xf32>
    %114 = arith.addf %112, %113 : vector<16x1xf32>
    %115 = arith.negf %114 : vector<16x1xf32>
    %116 = math.exp %115 : vector<16x1xf32>
    %cst_39 = arith.constant 1.000000e+00 : f32
    %117 = vector.broadcast %cst_39 : f32 to vector<16x1xf32>
    %118 = arith.addf %117, %116 : vector<16x1xf32>
    %119 = arith.divf %117, %118 : vector<16x1xf32>
    %c128_40 = arith.constant 128 : index
    %c0_41 = arith.constant 0 : index
    %120 = vector.load %arg3[%c128_40, %c0_41] : memref<136x128xf32, #tpu.memory_space<vmem>>, vector<2x16xf32>
    %121 = vector.broadcast %119 : vector<16x1xf32> to vector<16x32xf32>
    %122 = arith.mulf %121, %106 : vector<16x32xf32>
    %cst_42 = arith.constant dense<0.000000e+00> : vector<2x32xf32>
    %123 = tpu.matmul %120, %122, %cst_42 {dimension_numbers = #tpu.dot_dimension_numbers<[1], [0], [0], [1], [0, 0, 1, 1], [], []>} : vector<2x16xf32>, vector<16x32xf32>, vector<2x32xf32> -> vector<2x32xf32>
    %124 = vector.extract_strided_slice %106 {offsets = [0, 0], sizes = [8, 32], strides = [1, 1]} : vector<16x32xf32> to vector<8x32xf32>
    %cst_43 = arith.constant dense<0xFF800000> : vector<32xf32>
    %125 = vector.multi_reduction <maximumf>, %124, %cst_43 [0] : vector<8x32xf32> to vector<32xf32>
    %126 = vector.shape_cast %125 : vector<32xf32> to vector<1x32xf32>
    %127 = vector.extract_strided_slice %106 {offsets = [8, 0], sizes = [8, 32], strides = [1, 1]} : vector<16x32xf32> to vector<8x32xf32>
    %cst_44 = arith.constant dense<0xFF800000> : vector<32xf32>
    %128 = vector.multi_reduction <maximumf>, %127, %cst_44 [0] : vector<8x32xf32> to vector<32xf32>
    %129 = vector.shape_cast %128 : vector<32xf32> to vector<1x32xf32>
    %130 = tpu.concatenate %126, %129 in 0 : vector<1x32xf32>, vector<1x32xf32> -> vector<2x32xf32>
    %c0_45 = arith.constant 0 : index
    %c0_46 = arith.constant 0 : index
    %131 = vector.load %arg3[%c0_45, %c0_46] : memref<136x128xf32, #tpu.memory_space<vmem>>, vector<32x128xf32>
    %c32 = arith.constant 32 : index
    %c0_47 = arith.constant 0 : index
    %132 = vector.load %arg3[%c32, %c0_47] : memref<136x128xf32, #tpu.memory_space<vmem>>, vector<32x128xf32>
    %c80 = arith.constant 80 : index
    %c0_48 = arith.constant 0 : index
    %133 = vector.load %arg3[%c80, %c0_48] : memref<136x128xf32, #tpu.memory_space<vmem>>, vector<1x128xf32>
    %cst_49 = arith.constant dense<0.000000e+00> : vector<2x128xf32>
    %134 = tpu.matmul %123, %131, %cst_49 {dimension_numbers = #tpu.dot_dimension_numbers<[1], [0], [0], [1], [0, 0, 1, 1], [], []>} : vector<2x32xf32>, vector<32x128xf32>, vector<2x128xf32> -> vector<2x128xf32>
    %cst_50 = arith.constant dense<0.000000e+00> : vector<2x128xf32>
    %135 = tpu.matmul %130, %132, %cst_50 {dimension_numbers = #tpu.dot_dimension_numbers<[1], [0], [0], [1], [0, 0, 1, 1], [], []>} : vector<2x32xf32>, vector<32x128xf32>, vector<2x128xf32> -> vector<2x128xf32>
    %136 = arith.addf %134, %135 : vector<2x128xf32>
    %137 = vector.broadcast %133 : vector<1x128xf32> to vector<2x128xf32>
    %138 = arith.addf %136, %137 : vector<2x128xf32>
    %cst_51 = arith.constant 0.000000e+00 : f32
    %139 = vector.broadcast %cst_51 : f32 to vector<2x128xf32>
    %140 = arith.maximumf %138, %139 : vector<2x128xf32>
    %c64 = arith.constant 64 : index
    %c0_52 = arith.constant 0 : index
    %141 = vector.load %arg3[%c64, %c0_52] : memref<136x128xf32, #tpu.memory_space<vmem>>, vector<16x128xf32>
    %c88 = arith.constant 88 : index
    %c0_53 = arith.constant 0 : index
    %142 = vector.load %arg3[%c88, %c0_53] : memref<136x128xf32, #tpu.memory_space<vmem>>, vector<1x128xf32>
    %143 = vector.extract_strided_slice %140 {offsets = [0, 0], sizes = [2, 16], strides = [1, 1]} : vector<2x128xf32> to vector<2x16xf32>
    %cst_54 = arith.constant dense<0.000000e+00> : vector<2x128xf32>
    %144 = tpu.matmul %143, %141, %cst_54 {dimension_numbers = #tpu.dot_dimension_numbers<[1], [0], [0], [1], [0, 0, 1, 1], [], []>} : vector<2x16xf32>, vector<16x128xf32>, vector<2x128xf32> -> vector<2x128xf32>
    %145 = vector.broadcast %142 : vector<1x128xf32> to vector<2x128xf32>
    %146 = arith.addf %144, %145 : vector<2x128xf32>
    %c0_55 = arith.constant 0 : index
    %c0_56 = arith.constant 0 : index
    %c0_57 = arith.constant 0 : index
    %147 = vector.load %arg4[%c0_55, %c0_56, %c0_57] : memref<1x2x128xf32, #tpu.memory_space<vmem>>, vector<1x2x128xf32>
    %148 = vector.shape_cast %147 : vector<1x2x128xf32> to vector<2x128xf32>
    %149 = vector.shape_cast %146 : vector<2x128xf32> to vector<1x2x128xf32>
    tpu.vector_store %arg4[%c0_55, %c0_56, %c0_57], %149 {strides = array<i32>} : memref<1x2x128xf32, #tpu.memory_space<vmem>>, vector<1x2x128xf32>,
    return
  }
  func.func @transform_0(%arg0: i32) -> (i32, i32) {
    %c0_i32 = arith.constant 0 : i32
    %c0_i32_0 = arith.constant 0 : i32
    return %arg0, %c0_i32 : i32, i32
  }
  func.func @transform_1(%arg0: i32) -> (i32, i32) {
    %c0_i32 = arith.constant 0 : i32
    %c0_i32_0 = arith.constant 0 : i32
    %c0_i32_1 = arith.constant 0 : i32
    return %c0_i32, %c0_i32_0 : i32, i32
  }
  func.func @transform_2(%arg0: i32) -> (i32, i32) {
    %c0_i32 = arith.constant 0 : i32
    %c0_i32_0 = arith.constant 0 : i32
    %c0_i32_1 = arith.constant 0 : i32
    return %c0_i32, %c0_i32_0 : i32, i32
  }
  func.func @transform_3(%arg0: i32) -> (i32, i32, i32) {
    %c0_i32 = arith.constant 0 : i32
    %c0_i32_0 = arith.constant 0 : i32
    %c0_i32_1 = arith.constant 0 : i32
    return %arg0, %c0_i32, %c0_i32_0 : i32, i32, i32
  }
}

</mosaic_0001>

<bundles_post_ra>
// kernel: tile.0
= control target key start
LH: loop header
LB: loop body
LE: loop exit
PB: predicated region body
PF: predicated region fallthrough
CT: control target
= control target key end

     0   :  { %vm259_vm0 = vcmask 1047556   ;;  %vm261_vm1 = vcmask 130048   ;;  %s403_s14 = smov 16   ;;  %s404_s15 = smov 32   ;;  %vm280_vm2 = vcmask 523648   ;;  %vm301_vm3 = vcmask 392448   ;;  %s440_s0 = inlined_call_operand.vmem [shape: bf16[16,4,16], index: 0, kind: input, shape index: {}]   ;;  %s441_s1 = inlined_call_operand.vmem [shape: bf16[16,64], index: 1, kind: output, shape index: {}]  }
   0x1   :  { %v363_v0 = vld [vmem:[%s440_s0 + $0x18] sm:$0xff]   ;;  %v367_v1 = vld [vmem:[%s440_s0 + $0x10] sm:$0xff]   ;;  %v371_v2 = vld [vmem:[%s440_s0 + $0x8] sm:$0xff]   ;;  %vm322_vm4 = vcmask 261248  }
   0x2   :  { %v17_v3 = vunpack.c.h.bf16 %v363_v0  ;;  %v49_v4 = vunpack.c.l.bf16 %v363_v0  ;;  %v375_v5 = vld [vmem:[%s440_s0] sm:$0xff]   ;;  %v81_v6 = vunpack.c.h.bf16 %v367_v1  ;;  %v113_v7 = vunpack.c.l.bf16 %v367_v1  ;;  %s402_s0 = smov 48  }
   0x3   :  { %v145_v8 = vunpack.c.h.bf16 %v371_v2  ;;  %v177_v9 = vunpack.c.l.bf16 %v371_v2  ;;  %v209_v10 = vunpack.c.h.bf16 %v375_v5  ;;  %v240_v11 = vunpack.c.l.bf16 %v375_v5 }
   0x4   :  { %20 = vst [vmem:[#allocation1 + $0x70] ss:$8 sps:$4 sm:$0xff] %v17_v3   ;;  %52 = vst [vmem:[#allocation1 + $0x60] ss:$8 sps:$4 sm:$0xff] %v49_v4  }
   0x5   :  { %84 = vst [vmem:[#allocation1 + $0x50] ss:$8 sps:$4 sm:$0xff] %v81_v6   ;;  %116 = vst [vmem:[#allocation1 + $0x40] ss:$8 sps:$4 sm:$0xff] %v113_v7  }
   0x6   :  { %148 = vst [vmem:[#allocation1 + $0x30] ss:$8 sps:$4 sm:$0xff] %v145_v8   ;;  %180 = vst [vmem:[#allocation1 + $0x20] ss:$8 sps:$4 sm:$0xff] %v177_v9  }
   0x7   :  { %212 = vst [vmem:[#allocation1 + $0x10] ss:$8 sps:$4 sm:$0xff] %v209_v10   ;;  %243 = vst [vmem:[#allocation1] ss:$8 sps:$4 sm:$0xff] %v240_v11  }
   0xb   :  { %v285_v12 = vld [vmem:[#allocation1 + $0x43] ss:$8 sm:$0xf0]   ;;  %v306_v13 = vld [vmem:[#allocation1 + $0x42] ss:$8 sm:$0xf0]  }
   0xc   :  { %v283_v14 = vld [vmem:[#allocation1 + $0x43] ss:$8 sm:$0xf]   ;;  %v304_v15 = vld [vmem:[#allocation1 + $0x42] ss:$8 sm:$0xf]  }
   0xd   :  { %v275_v16 = vld [vmem:[#allocation1 + $0x3] ss:$8 sm:$0xf0]   ;;  %v287_v17 = vsel %vm259_vm0, %v285_v12, %v283_v14  ;;  %v296_v18 = vld [vmem:[#allocation1 + $0x2] ss:$8 sm:$0xf0]   ;;  %v308_v23 = vsel %vm259_vm0, %v306_v13, %v304_v15 }
   0xe   :  { %v273_v19 = vld [vmem:[#allocation1 + $0x3] ss:$8 sm:$0xf]   ;;  %v294_v20 = vld [vmem:[#allocation1 + $0x2] ss:$8 sm:$0xf]  }
   0xf   :  { %v277_v21 = vsel %vm259_vm0, %v275_v16, %v273_v19  ;;  %v298_v22 = vsel %vm259_vm0, %v296_v18, %v294_v20  ;;  %v315_v24 = vld [vmem:[#allocation1 + $0x1] ss:$8 sm:$0xf]   ;;  %v257_v31 = vld [vmem:[#allocation1] ss:$8 sm:$0xf]  }
  0x10   :  { %v317_v25 = vld [vmem:[#allocation1 + $0x1] ss:$8 sm:$0xf0]   ;;  %v387_v26 = vpack.i.bf16 %v287_v17, %v277_v21  ;;  %v258_v32 = vld [vmem:[#allocation1] ss:$8 sm:$0xf0]   ;;  %v392_v33 = vpack.i.bf16 %v308_v23, %v298_v22 }
  0x11   :  { %v319_v27 = vsel %vm259_vm0, %v317_v25, %v315_v24  ;;  %v325_v28 = vld [vmem:[#allocation1 + $0x41] ss:$8 sm:$0xf]   ;;  %v260_v35 = vsel %vm259_vm0, %v258_v32, %v257_v31  ;;  %v264_v36 = vld [vmem:[#allocation1 + $0x40] ss:$8 sm:$0xf]  }
  0x12   :  { %v327_v29 = vld [vmem:[#allocation1 + $0x41] ss:$8 sm:$0xf0]   ;;  %388 = vrot.lane.b32.xlu0 %v387_v26, %s402_s0  ;;  %v266_v37 = vld [vmem:[#allocation1 + $0x40] ss:$8 sm:$0xf0]  }
  0x13   :  { %v329_v30 = vsel %vm259_vm0, %v327_v29, %v325_v28  ;;  %262 = vst.msk [vmem:[#allocation0] sm:$0xff] %vm261_vm1, %v260_v35   ;;  %v268_v38 = vsel %vm259_vm0, %v266_v37, %v264_v36 }
  0x14   :  { %v397_v34 = vpack.i.bf16 %v329_v30, %v319_v27  ;;  %271 = vst.msk [vmem:[#allocation0 + $0x8] sm:$0xff] %vm261_vm1, %v268_v38  }
  0x16   :  { %398 = vrot.lane.b32.xlu1 %v397_v34, %s403_s14  ;;  %393 = vrot.lane.b32.xlu0 %v392_v33, %s404_s15 }
  0x84   :  { %v389_v39 = vpop.permute.xlu0 %388 }
  0x85   :  { %v391_v40 = vunpack.i.h.bf16 %v389_v39  ;;  %v390_v41 = vunpack.i.l.bf16 %v389_v39 }
  0x87   :  { %281 = vst.msk [vmem:[#allocation0] sm:$0xff] %vm280_vm2, %v390_v41   ;;  %292 = vst.msk [vmem:[#allocation0 + $0x8] sm:$0xff] %vm280_vm2, %v391_v40  }
  0x88   :  { %v399_v42 = vpop.permute.xlu1 %398  ;;  %v394_v43 = vpop.permute.xlu0 %393 }
  0x89   :  { %v401_v44 = vunpack.i.h.bf16 %v399_v42  ;;  %v400_v45 = vunpack.i.l.bf16 %v399_v42  ;;  %v396_v46 = vunpack.i.h.bf16 %v394_v43  ;;  %v395_v47 = vunpack.i.l.bf16 %v394_v43 }
  0x8b   :  { %302 = vst.msk [vmem:[#allocation0] sm:$0xff] %vm301_vm3, %v395_v47   ;;  %313 = vst.msk [vmem:[#allocation0 + $0x8] sm:$0xff] %vm301_vm3, %v396_v46  }
  0x8c   :  { %323 = vst.msk [vmem:[#allocation0] sm:$0xff] %vm322_vm4, %v400_v45   ;;  %334 = vst.msk [vmem:[#allocation0 + $0x8] sm:$0xff] %vm322_vm4, %v401_v44  }
  0x93   :  { %v339_v48 = vld [vmem:[#allocation0] sm:$0xff]  ;;  %v344_v49 = vld [vmem:[#allocation0 + $0x8] sm:$0xff] }
  0x94   :  { %v382_v50 = vpack.c.bf16 %v344_v49, %v339_v48 }
  0x96   :  { %383 = vst [vmem:[%s441_s1] sm:$0xff] %v382_v50  }

// kernel: gat_forward.1
= control target key start
LH: loop header
LB: loop body
LE: loop exit
PB: predicated region body
PF: predicated region fallthrough
CT: control target
= control target key end

     0   :  { %8 = vsyncpa [#allocation3], 0  ;;  %s1850_s12 = smov [#allocation2]   ;;  %s2195_s0 = inlined_call_operand.vmem [shape: bf16[16,128], index: 0, kind: input, shape index: {}]   ;;  %s2196_s1 = inlined_call_operand.hbm [shape: bf16[544,256], index: 1, kind: input, shape index: {}]   ;;  %s2197_s2 = inlined_call_operand.vmem [shape: f32[136,128], index: 2, kind: input, shape index: {}]   ;;  %s2198_s3 = inlined_call_operand.vmem [shape: f32[1,2,128], index: 3, kind: output, shape index: {}]  }
   0x1   :  { %s16_s13 = sshll.u32 %s1850_s12, 4  ;;  %s1826_s16 = scalar_lea.hbm %s2196_s1, 8704  ;;  %s17_s13 = int_to_ptr.vmem [resolvable:$true] %s16_s13 }
   0x2   :  { %p1827_p0 = scmp.ne.s32.totalorder %s2196_s1, %s1826_s16  ;;  %p1830_p1 = scmp.lt.u32.totalorder %s1826_s16, %s2196_s1 }
   0x4   :  { %p1832_p2 = pnand %p1830_p1, %p1827_p0 }
   0x6   :  { %1835 = shalt.err (!%p1832_p2)
}
   0x7   :  { %s1836_s21 = scalar_lea.vmem %s17_s13, 8704  ;;  %p1841_p4 = scmp.lt.s32.totalorder %s17_s13, %s17_s13 }
   0x8   :  { %p1837_p3 = scmp.ne.s32.totalorder %s17_s13, %s1836_s21  ;;  %p1842_p5 = scmp.lt.s32.totalorder %s1836_s21, %s1836_s21 }
   0xa   :  { %p1843_p6 = por %p1842_p5, %p1841_p4 }
   0xc   :  { %p1844_p7 = pnand %p1843_p6, %p1837_p3 }
   0xe   :  { %1847 = shalt.err (!%p1844_p7)
}
   0xf   :  { %s1851_s22 = smov 128   ;;  %s1852_s23 = smov 8  }
  0x10   :  { %22 = dma.hbm_to_vmem [thread:$0]  %s2196_s1, 8704, %s17_s13, [#allocation3], %s1851_s22, %s1851_s22, %s1852_s23  }
  0x11   :  { %1848 = dma.done.wait [#allocation3], 8704  }
  0x12   :  { %1849 = vsyncadd [#allocation3], 4294958592  ;;  %v1853_v0 = vmov 0   ;;  %v1854_v1 = vmov 0.0   ;;  %v1746_v2 = vld [vmem:[#allocation2 + $0x4] ss:$8 sps:$4 sm:$0xff]  }
  0x13   :  { %139 = vmatprep.mubr.bf16.mxu0 %v1853_v0  ;;  %1571 = vmatprep.subr.bf16.mxu1 %v1854_v1  ;;  %v1748_v3 = vld [vmem:[#allocation2] ss:$8 sps:$4 sm:$0xff]   ;;  %v32_v5 = vld [vmem:[%s2195_s0 + $0x4] sm:$0xf]  ;;  %v1750_v7 = vld [vmem:[#allocation2 + $0x90] ss:$8 sps:$4 sm:$0xff]  }
  0x14   :  { %1744 = vset.pattern.permute.xlu0 %v1853_v0  ;;  %1745 = vset.pattern.permute.xlu1 %v1853_v0  ;;  %v1900_v4 = vld [vmem:[%s2195_s0] sm:$0xf]  ;;  %vm103_vm0 = vcmask 130048   ;;  %v1909_v9 = vld [vmem:[#allocation2 + $0x194] ss:$8 sps:$4 sm:$0xff]   ;;  %vm1855_vm1 = vmmov 0  }
  0x15   :  { %107 = vmatprep.subr.bf16.mxu0 %v1746_v2  ;;  %v1437_v6 = vcombine.low %v1900_v4, %v32_v5  ;;  %1572 = vmatpush3.bf16.msra.mxu1 %v1750_v7  ;;  %v1751_v8 = vld [vmem:[#allocation2 + $0xa0] ss:$8 sps:$4 sm:$0xff]   ;;  %v1752_v10 = vld [vmem:[#allocation2 + $0xb0] ss:$8 sps:$4 sm:$0xff]   ;;  %v1913_v11 = vld [vmem:[#allocation2 + $0x1a4] ss:$8 sps:$4 sm:$0xff]  }
  0x16   :  { %108 = vmatpush1.bf16.msra.mxu0 %v1748_v3  ;;  %1573 = vmatprep.subr.bf16.mxu1 %v1854_v1  ;;  %v1753_v12 = vld [vmem:[#allocation2 + $0xc0] ss:$8 sps:$4 sm:$0xff]   ;;  %v1754_v13 = vld [vmem:[#allocation2 + $0xd0] ss:$8 sps:$4 sm:$0xff]   ;;  %v1923_v16 = vld [vmem:[#allocation2 + $0x1b4] ss:$8 sps:$4 sm:$0xff]  }
  0x17   :  { %1591 = vmatprep.subr.bf16.mxu0 %v1854_v1  ;;  %v1756_v14 = vld [vmem:[#allocation2 + $0xe0] ss:$8 sps:$4 sm:$0xff]   ;;  %v1758_v15 = vld [vmem:[#allocation2 + $0xf0] ss:$8 sps:$4 sm:$0xff]   ;;  %v1927_v18 = vld [vmem:[#allocation2 + $0x1c4] ss:$8 sps:$4 sm:$0xff]   ;;  %1587 = vmatprep.mubr.msk.bf16.mxu1 %vm1855_vm1, %v1854_v1 }
  0x18   :  { %v1760_v17 = vld [vmem:[#allocation2 + $0x100] ss:$8 sps:$4 sm:$0xff]   ;;  %vm265_vm2 = vcmp.gt.bf16.partialorder %v32_v5, 0  ;;  %s1856_s0 = smov 48   ;;  %v1945_v27 = vld [vmem:[#allocation2 + $0x1d0] ss:$8 sps:$4 sm:$0xff]  }
  0x19   :  { %1440 = vmatmul.mubr.msk.bf16.vlgmr.msra.gmra.mrb[0].mxu0 %vm103_vm0, %v1437_v6  ;;  %1574 = vmatpush3.bf16.msra.mxu1 %v1751_v8  ;;  %v267_v24 = vsel %vm265_vm2, 65537, %v1853_v0  ;;  %v59_v28 = vunpack.c.l.bf16 %v1945_v27  ;;  %v60_v29 = vunpack.c.h.bf16 %v1945_v27  ;;  %vm242_vm4 = vcmask 523264   ;;  %s1857_s29 = smov 64   ;;  %v1981_v8 = vld [vmem:[#allocation2 + $0x1e0] ss:$8 sps:$4 sm:$0xff]   ;;  %s1858_s7 = smov 96  }
  0x1a   :  { %1575 = vmatprep.subr.bf16.mxu1 %v1854_v1  ;;  %1592 = vmatpush3.bf16.msra.mxu0 %v1909_v9  ;;  %v269_v25 = vunpack.c.l.b16 %v267_v24  ;;  %vm264_vm5 = vcmp.gt.bf16.partialorder %v1900_v4, 0  ;;  %vm282_vm10 = vcmask 1048064   ;;  %v2001_v24 = vld [vmem:[#allocation2 + $0x190] ss:$16 sps:$4 sm:$0xff]   ;;  %s1860_s12 = smov 32   ;;  %vm1063_vm2 = vcmask 261120  }
  0x1b   :  { %1593 = vmatprep.subr.bf16.mxu0 %v1854_v1  ;;  %1599 = vmatprep.mubr.msk.bf16.mxu0 %vm1855_vm1, %v1854_v1  ;;  %v266_v41 = vsel %vm264_vm5, 65537, %v1853_v0 }
  0x1c   :  { %vm271_vm3 = vcmp.ne.s32.totalorder %v269_v25, 0  ;;  %v268_v44 = vunpack.c.l.b16 %v266_v41  ;;  %v43_v25 = vunpack.c.h.bf16 %v2001_v24 }
  0x1d   :  { %1576 = vmatpush3.bf16.msra.mxu1 %v1752_v10  ;;  %v273_v26 = vsel %vm271_vm3, 1, %v1853_v0  ;;  %v1983_v10 = vld [vmem:[#allocation2 + $0x1f0] ss:$8 sps:$4 sm:$0xff]   ;;  %vm1188_vm3 = vcmask 1040384  }
  0x1e   :  { %1577 = vmatprep.subr.bf16.mxu1 %v1854_v1  ;;  %1594 = vmatpush3.bf16.msra.mxu0 %v1913_v11  ;;  %vm270_vm6 = vcmp.ne.s32.totalorder %v268_v44, 0 }
  0x1f   :  { %1595 = vmatprep.subr.bf16.mxu0 %v1854_v1  ;;  %276 = vrot.lane.b32.xlu1 %v273_v26, %s1856_s0  ;;  %v272_v47 = vsel %vm270_vm6, 1, %v1853_v0  ;;  %v2004_v26 = vld [vmem:[#allocation2 + $0x198] ss:$16 sps:$4 sm:$0xff]  }
  0x21   :  { %1578 = vmatpush3.bf16.msra.mxu1 %v1753_v12  ;;  %v1989_v12 = vld [vmem:[#allocation2 + $0x200] ss:$8 sps:$4 sm:$0xff]  }
  0x22   :  { %1579 = vmatprep.subr.bf16.mxu1 %v1854_v1  ;;  %1596 = vmatpush3.bf16.msra.mxu0 %v1923_v16 }
  0x23   :  { %1597 = vmatprep.subr.bf16.mxu0 %v1854_v1 }
  0x25   :  { %1580 = vmatpush3.bf16.msra.mxu1 %v1754_v13  ;;  %v1993_v13 = vld [vmem:[#allocation2 + $0x210] ss:$8 sps:$4 sm:$0xff]  }
  0x26   :  { %1581 = vmatprep.subr.bf16.mxu1 %v1854_v1  ;;  %1598 = vmatpush3.bf16.msra.mxu0 %v1927_v18 }
  0x29   :  { %1582 = vmatpush3.bf16.msra.mxu1 %v1756_v14 }
  0x2a   :  { %1583 = vmatprep.subr.bf16.mxu1 %v1854_v1 }
  0x2d   :  { %1584 = vmatpush3.bf16.msra.mxu1 %v1758_v15 }
  0x2e   :  { %1585 = vmatprep.subr.bf16.mxu1 %v1854_v1 }
  0x31   :  { %1586 = vmatpush3.bf16.msra.mxu1 %v1760_v17 }
  0x91   :  { %v1959_v48 = vpop.permute.xlu1 %276 }
  0x92   :  { %vm279_vm7 = vcmp.ne.s32.totalorder %v1959_v48, 0 }
  0xec   :  { %v141_v19 = vpop.f32.mrb[0].mxu0 }
  0xed   :  { %v1934_v20 = vpop.f32.mrb[1].mxu0 }
  0xee   :  { %v145_v21 = vpop.f32.mrb[2].mxu0 }
  0xef   :  { %v1936_v22 = vpack.c.bf16 %v145_v21, %v141_v19  ;;  %v1938_v23 = vpop.f32.mrb[3].mxu0 }
  0xf1   :  { %1588 = vmatmul.mubr.bf16.vlgmr.msra.gmra.mrb[0].mxu1 %v1936_v22  ;;  %1603 = vmatprep.subr.bf16.mxu0 %v1936_v22 }
  0xf2   :  { %698 = vmatprep.mubr.bf16.mxu1 %v1853_v0 }
 0x1c4   :  { %v233_v30 = vpop.f32.mrb[0].mxu1 }
 0x1c5   :  { %v240_v31 = vmul.f32 %v233_v30, %v59_v28  ;;  %v1589_v32 = vpop.f32.mrb[1].mxu1 }
 0x1c6   :  { %v236_v33 = vpop.f32.mrb[2].mxu1 }
 0x1c7   :  { %v241_v34 = vmul.f32 %v236_v33, %v60_v29  ;;  %v1590_v35 = vpop.f32.mrb[3].mxu1  ;;  %v243_v36 = vsel %vm242_vm4, %v240_v31, 0.0  ;;  %v44_v31 = vunpack.c.h.bf16 %v2004_v26 }
 0x1c9   :  { %v244_v37 = vsel %vm242_vm4, %v241_v34, 0.0 }
 0x1ca   :  { %v245_v38 = vadd.f32 %v244_v37, %v243_v36 }
 0x1cc   :  { %v246_v39 = vrot.slane %v245_v38, 4 }
 0x1ce   :  { %v247_v40 = vadd.f32 %v246_v39, %v245_v38 }
 0x1d0   :  { %v248_v42 = vrot.slane %v247_v40, 2 }
 0x1d2   :  { %v249_v43 = vadd.f32 %v248_v42, %v247_v40 }
 0x1d4   :  { %v250_v45 = vrot.slane %v249_v43, 1 }
 0x1d6   :  { %v251_v46 = vadd.f32 %v250_v45, %v249_v43  ;;  %v2017_v43 = vld [vmem:[#allocation2 + $0x1b0] ss:$16 sps:$4 sm:$0xff]   ;;  %v2020_v45 = vld [vmem:[#allocation2 + $0x1b8] ss:$16 sps:$4 sm:$0xff]  }
 0x1d7   :  { %v47_v44 = vunpack.c.h.bf16 %v2017_v43 }
 0x1d8   :  { %253 = vrot.lane.b32.xlu0 %v251_v46, %s1857_s29  ;;  %v45_v46 = vunpack.c.l.bf16 %v2017_v43 }
 0x1dc   :  { %274 = vrot.lane.b32.xlu0 %v272_v47, %s1856_s0  ;;  %v48_v47 = vunpack.c.h.bf16 %v2020_v45 }
 0x24a   :  { %v254_v49 = vpop.permute.xlu0 %253 }
 0x24b   :  { %v256_v50 = vadd.f32 %v254_v49, %v233_v30  ;;  %v257_v51 = vadd.f32 %v254_v49, %v236_v33  ;;  %v41_v30 = vunpack.c.l.bf16 %v2001_v24  ;;  %v42_v33 = vunpack.c.l.bf16 %v2004_v26 }
 0x24d   :  { %v260_v52 = vmul.f32 0.2, %v256_v50  ;;  %v261_v53 = vmul.f32 0.2, %v257_v51  ;;  %vm259_vm8 = vcmp.gt.f32.partialorder %v257_v51, 0.0  ;;  %vm258_vm9 = vcmp.gt.f32.partialorder %v256_v50, 0.0 }
 0x24e   :  { %v1962_v54 = vpop.permute.xlu0 %274 }
 0x24f   :  { %vm278_vm11 = vcmp.ne.s32.totalorder %v1962_v54, 0  ;;  %v263_v55 = vsel %vm259_vm8, %v257_v51, %v261_v53  ;;  %v262_v56 = vsel %vm258_vm9, %v256_v50, %v260_v52  ;;  %v46_v50 = vunpack.c.l.bf16 %v2020_v45 }
 0x250   :  { %v281_v57 = vsel %vm279_vm7, %v263_v55, -1e+30  ;;  %v280_v58 = vsel %vm278_vm11, %v262_v56, -1e+30 }
 0x251   :  { %v286_v59 = vsel %vm282_vm10, %v281_v57, -inf  ;;  %v283_v60 = vsel %vm282_vm10, %v280_v58, -inf }
 0x252   :  { %287 = vmax.xlane.f32.xlu0 %v286_v59  ;;  %284 = vmax.xlane.f32.xlu1 %v283_v60 }
 0x2df   :  { %v285_v61 = vpop.xlane.xlu1 %284  ;;  %v288_v62 = vpop.xlane.xlu0 %287 }
 0x2e0   :  { %v289_v63 = vsub.f32 %v280_v58, %v285_v61  ;;  %v290_v0 = vsub.f32 %v281_v57, %v288_v62  ;;  %v1766_v61 = vld [vmem:[#allocation2 + $0x10] ss:$8 sps:$4 sm:$0xff]   ;;  %v1768_v62 = vld [vmem:[#allocation2 + $0x14] ss:$8 sps:$4 sm:$0xff]  }
 0x2e1   :  { %666 = vmatprep.subr.bf16.mxu1 %v1768_v62 }
 0x2e2   :  { %v291_v2 = vmul.f32 1.442695, %v289_v63  ;;  %v293_v3 = vmul.f32 1.442695, %v290_v0  ;;  %v1771_v63 = vld [vmem:[#allocation2 + $0x24] ss:$8 sps:$4 sm:$0xff]   ;;  %667 = vmatpush1.bf16.msra.mxu1 %v1766_v61 }
 0x2e3   :  { %v1769_v0 = vld [vmem:[#allocation2 + $0x20] ss:$8 sps:$4 sm:$0xff]   ;;  %668 = vmatprep.subr.bf16.mxu1 %v1771_v63 }
 0x2e4   :  { %1798 = vpow2.f32 %v291_v2 }
 0x2e5   :  { %1800 = vpow2.f32 %v293_v3 }
 0x2e6   :  { %669 = vmatpush1.bf16.msra.mxu1 %v1769_v0 }
 0x2ee   :  { %v1971_v4 = vpop.eup %1798 }
 0x2ef   :  { %v1973_v5 = vpop.eup %1800 }
 0x2f0   :  { %v295_v6 = vpack.c.bf16 %v1973_v5, %v1971_v4 }
 0x2f2   :  { %297 = vrot.lane.b32.xlu0 %v295_v6, %s1857_s29 }
 0x364   :  { %v298_v7 = vpop.permute.xlu0 %297 }
 0x365   :  { %1600 = vmatmul.mubr.msk.bf16.vlgmr.msra.gmra.mrb[4].mxu0 %vm242_vm4, %v298_v7 }
 0x366   :  { %1604 = vmatpush3.bf16.msra.mxu0 %v1936_v22  ;;  %1605 = vmatprep.mubr.msk.bf16.mxu0 %vm103_vm0, %v1981_v8 }
 0x367   :  { %1613 = vmatprep.subr.bf16.mxu0 %v1854_v1 }
 0x36d   :  { %1606 = vmatmul.mubr.msk.bf16.vlgmr.msra.gmra.mrb[8].mxu0 %vm103_vm0, %v1983_v10 }
 0x36e   :  { %1609 = vmatprep.mubr.msk.bf16.mxu0 %vm103_vm0, %v1989_v12 }
 0x375   :  { %1610 = vmatmul.mubr.msk.bf16.gmra.mrb[12].mxu0 %vm103_vm0, %v1993_v13 }
 0x376   :  { %1621 = vmatprep.mubr.msk.bf16.mxu0 %vm1855_vm1, %v1854_v1 }
 0x438   :  { %v360_v14 = vpop.f32.mrb[4].mxu0 }
 0x439   :  { %1802 = vrcp.f32 %v360_v14  ;;  %v1601_v15 = vpop.f32.mrb[5].mxu0 }
 0x43a   :  { %v363_v17 = vpop.f32.mrb[6].mxu0 }
 0x43b   :  { %v1602_v19 = vpop.f32.mrb[7].mxu0  ;;  %1804 = vrcp.f32 %v363_v17  ;;  %v1774_v17 = vld [vmem:[#allocation2 + $0x34] ss:$8 sps:$4 sm:$0xff]  }
 0x43c   :  { %v1772_v19 = vld [vmem:[#allocation2 + $0x30] ss:$8 sps:$4 sm:$0xff]   ;;  %670 = vmatprep.subr.bf16.mxu1 %v1774_v17 }
 0x43d   :  { %671 = vmatpush1.bf16.msra.mxu1 %v1772_v19 }
 0x440   :  { %v1607_v32 = vpop.f32.mrb[8].mxu0 }
 0x441   :  { %v478_v34 = vmul.f32 %v1607_v32, %v43_v25  ;;  %v445_v35 = vpop.f32.mrb[9].mxu0  ;;  %v1778_v32 = vld [vmem:[#allocation2 + $0x50] ss:$8 sps:$4 sm:$0xff]  }
 0x442   :  { %v476_v36 = vmul.f32 %v445_v35, %v41_v30  ;;  %v1608_v37 = vpop.f32.mrb[10].mxu0  ;;  %v1786_v35 = vld [vmem:[#allocation2 + $0x74] ss:$8 sps:$4 sm:$0xff]  }
 0x443   :  { %v1803_v21 = vpop.eup %1802  ;;  %v479_v38 = vmul.f32 %v1608_v37, %v44_v31  ;;  %v448_v39 = vpop.f32.mrb[11].mxu0  ;;  %v1789_v37 = vld [vmem:[#allocation2 + $0x84] ss:$8 sps:$4 sm:$0xff]  }
 0x444   :  { %371 = vrot.lane.b32.xlu1 %v1803_v21, %s1857_s29  ;;  %v477_v40 = vmul.f32 %v448_v39, %v42_v33  ;;  %v1777_v21 = vld [vmem:[#allocation2 + $0x44] ss:$8 sps:$4 sm:$0xff]   ;;  %v1790_v39 = vld [vmem:[#allocation2 + $0x110] ss:$8 sps:$4 sm:$0xff]  }
 0x445   :  { %v1805_v22 = vpop.eup %1804  ;;  %v485_v41 = vpack.c.bf16 %v479_v38, %v478_v34  ;;  %672 = vmatprep.subr.bf16.mxu1 %v1777_v21  ;;  %v1781_v34 = vld [vmem:[#allocation2 + $0x60] ss:$8 sps:$4 sm:$0xff]  }
 0x446   :  { %v484_v42 = vpack.c.bf16 %v477_v40, %v476_v36  ;;  %v1784_v36 = vld [vmem:[#allocation2 + $0x70] ss:$8 sps:$4 sm:$0xff]   ;;  %v1787_v38 = vld [vmem:[#allocation2 + $0x80] ss:$8 sps:$4 sm:$0xff]  }
 0x447   :  { %v1791_v40 = vld [vmem:[#allocation2 + $0x120] ss:$8 sps:$4 sm:$0xff]  }
 0x448   :  { %373 = vrot.lane.b32.xlu1 %v1805_v22, %s1857_s29  ;;  %1614 = vmatpush3.bf16.msra.mxu0 %v484_v42  ;;  %v1611_v49 = vpop.f32.mrb[12].mxu0  ;;  %v1775_v22 = vld [vmem:[#allocation2 + $0x40] ss:$8 sps:$4 sm:$0xff]  }
 0x449   :  { %1615 = vmatprep.subr.bf16.mxu0 %v1854_v1  ;;  %v482_v51 = vmul.f32 %v1611_v49, %v47_v44  ;;  %v461_v52 = vpop.f32.mrb[13].mxu0  ;;  %673 = vmatpush1.bf16.msra.mxu1 %v1775_v22  ;;  %v1793_v42 = vld [vmem:[#allocation2 + $0x140] ss:$8 sps:$4 sm:$0xff]   ;;  %v1794_v49 = vld [vmem:[#allocation2 + $0x150] ss:$8 sps:$4 sm:$0xff]  }
 0x44a   :  { %v480_v53 = vmul.f32 %v461_v52, %v45_v46  ;;  %v1612_v55 = vpop.f32.mrb[14].mxu0  ;;  %v1796_v52 = vld [vmem:[#allocation2 + $0x170] ss:$8 sps:$4 sm:$0xff]  }
 0x44b   :  { %v483_v56 = vmul.f32 %v1612_v55, %v48_v47  ;;  %v464_v57 = vpop.f32.mrb[15].mxu0 }
 0x44c   :  { %1616 = vmatpush3.bf16.msra.mxu0 %v485_v41  ;;  %v481_v58 = vmul.f32 %v464_v57, %v46_v50  ;;  %v1792_v41 = vld [vmem:[#allocation2 + $0x130] ss:$8 sps:$4 sm:$0xff]  }
 0x44d   :  { %1617 = vmatprep.subr.bf16.mxu0 %v1854_v1  ;;  %v487_v59 = vpack.c.bf16 %v483_v56, %v482_v51  ;;  %v1795_v51 = vld [vmem:[#allocation2 + $0x160] ss:$8 sps:$4 sm:$0xff]  }
 0x44e   :  { %v486_v60 = vpack.c.bf16 %v481_v58, %v480_v53  ;;  %v1463_v53 = vld [vmem:[%s2197_s2 + $0x70] ss:$0 sm:$0xff] }
 0x450   :  { %1618 = vmatpush3.bf16.msra.mxu0 %v486_v60 }
 0x451   :  { %1619 = vmatprep.subr.bf16.mxu0 %v1854_v1 }
 0x454   :  { %1620 = vmatpush3.bf16.msra.mxu0 %v487_v59 }
 0x455   :  { %1625 = vmatprep.subr.bf16.mxu0 %v1854_v1 }
 0x4b6   :  { %v372_v2 = vpop.permute.xlu1 %371 }
 0x4b7   :  { %v377_v6 = vmul.f32 %v1971_v4, %v372_v2  ;;  %v1780_v4 = vld [vmem:[#allocation2 + $0x54] ss:$8 sps:$4 sm:$0xff]  }
 0x4b8   :  { %674 = vmatprep.subr.bf16.mxu1 %v1780_v4 }
 0x4b9   :  { %675 = vmatpush1.bf16.msra.mxu1 %v1778_v32 }
 0x4ba   :  { %v374_v3 = vpop.permute.xlu1 %373 }
 0x4bb   :  { %v378_v7 = vmul.f32 %v1973_v5, %v374_v3  ;;  %v1783_v5 = vld [vmem:[#allocation2 + $0x64] ss:$8 sps:$4 sm:$0xff]  }
 0x4bc   :  { %676 = vmatprep.subr.bf16.mxu1 %v1783_v5 }
 0x4bd   :  { %v488_v14 = vpack.c.bf16 %v378_v7, %v377_v6  ;;  %677 = vmatpush1.bf16.msra.mxu1 %v1781_v34 }
 0x4be   :  { %678 = vmatprep.subr.bf16.mxu1 %v1786_v35 }
 0x4bf   :  { %490 = vrot.lane.b32.xlu0 %v488_v14, %s1857_s29 }
 0x4c1   :  { %679 = vmatpush1.bf16.msra.mxu1 %v1784_v36 }
 0x4c2   :  { %680 = vmatprep.subr.bf16.mxu1 %v1789_v37 }
 0x4c5   :  { %681 = vmatpush1.bf16.msra.mxu1 %v1787_v38 }
 0x4c6   :  { %1645 = vmatprep.subr.bf16.mxu1 %v1854_v1 }
 0x531   :  { %v491_v15 = vpop.permute.xlu0 %490 }
 0x532   :  { %1622 = vmatmul.mubr.msk.bf16.vlgmr.msra.gmra.mrb[16].mxu0 %vm242_vm4, %v491_v15 }
 0x533   :  { %1641 = vmatprep.mubr.msk.bf16.mxu0 %vm1855_vm1, %v1854_v1  ;;  %1626 = vmatpush3.bf16.msra.mxu0 %v1790_v39 }
 0x534   :  { %1627 = vmatprep.subr.bf16.mxu0 %v1854_v1 }
 0x537   :  { %1628 = vmatpush3.bf16.msra.mxu0 %v1791_v40 }
 0x538   :  { %1629 = vmatprep.subr.bf16.mxu0 %v1854_v1 }
 0x53b   :  { %1630 = vmatpush3.bf16.msra.mxu0 %v1792_v41 }
 0x53c   :  { %1631 = vmatprep.subr.bf16.mxu0 %v1854_v1 }
 0x53f   :  { %1632 = vmatpush3.bf16.msra.mxu0 %v1793_v42 }
 0x540   :  { %1633 = vmatprep.subr.bf16.mxu0 %v1854_v1 }
 0x543   :  { %1634 = vmatpush3.bf16.msra.mxu0 %v1794_v49 }
 0x544   :  { %1635 = vmatprep.subr.bf16.mxu0 %v1854_v1 }
 0x547   :  { %1636 = vmatpush3.bf16.msra.mxu0 %v1795_v51 }
 0x548   :  { %1637 = vmatprep.subr.bf16.mxu0 %v1854_v1 }
 0x54b   :  { %1638 = vmatpush3.bf16.msra.mxu0 %v1796_v52 }
 0x54c   :  { %1639 = vmatprep.subr.bf16.mxu0 %v1854_v1 }
 0x605   :  { %v529_v55 = vpop.f32.mrb[16].mxu0 }
 0x606   :  { %v530_v56 = vadd.f32 %v529_v55, %v1934_v20  ;;  %v1623_v57 = vpop.f32.mrb[17].mxu0 }
 0x607   :  { %v532_v58 = vpop.f32.mrb[18].mxu0 }
 0x608   :  { %v540_v59 = vadd.f32 %v1463_v53, %v530_v56  ;;  %v533_v60 = vadd.f32 %v532_v58, %v1938_v23  ;;  %v1624_v61 = vpop.f32.mrb[19].mxu0  ;;  %v1797_v23 = vld [vmem:[#allocation2 + $0x180] ss:$8 sps:$4 sm:$0xff]  }
 0x609   :  { %1640 = vmatpush3.bf16.msra.mxu0 %v1797_v23 }
 0x60a   :  { %v544_v62 = vmul.f32 1.442695, %v540_v59  ;;  %v541_v63 = vadd.f32 %v1463_v53, %v533_v60  ;;  %vm542_vm12 = vcmp.gt.f32.partialorder %v540_v59, 0.0 }
 0x60c   :  { %1806 = vpow2.f32 %v544_v62  ;;  %v546_v0 = vmul.f32 1.442695, %v541_v63  ;;  %vm543_vm13 = vcmp.gt.f32.partialorder %v541_v63, 0.0 }
 0x60e   :  { %1808 = vpow2.f32 %v546_v0 }
 0x616   :  { %v1807_v2 = vpop.eup %1806 }
 0x617   :  { %v1464_v3 = vadd.f32 -1.0, %v1807_v2 }
 0x618   :  { %v1809_v6 = vpop.eup %1808 }
 0x619   :  { %v1465_v7 = vadd.f32 -1.0, %v1809_v6  ;;  %v550_v14 = vsel %vm542_vm12, %v540_v59, %v1464_v3 }
 0x61b   :  { %v551_v15 = vsel %vm543_vm13, %v541_v63, %v1465_v7 }
 0x61c   :  { %v585_v20 = vpack.c.bf16 %v551_v15, %v550_v14 }
 0x61e   :  { %699 = vmatmul.mubr.bf16.vlgmr.msra.gmra.mrb[4].mxu1 %v585_v20 }
 0x61f   :  { %1646 = vmatpush3.bf16.msra.mxu1 %v1909_v9  ;;  %1653 = vmatprep.mubr.msk.bf16.mxu1 %vm1855_vm1, %v1854_v1 }
 0x620   :  { %1647 = vmatprep.subr.bf16.mxu1 %v1854_v1 }
 0x623   :  { %1648 = vmatpush3.bf16.msra.mxu1 %v1913_v11 }
 0x624   :  { %1649 = vmatprep.subr.bf16.mxu1 %v1854_v1 }
 0x627   :  { %1650 = vmatpush3.bf16.msra.mxu1 %v1923_v16 }
 0x628   :  { %1651 = vmatprep.subr.bf16.mxu1 %v1854_v1 }
 0x62b   :  { %1652 = vmatpush3.bf16.msra.mxu1 %v1927_v18 }
 0x62c   :  { %1667 = vmatprep.subr.bf16.mxu1 %v1854_v1 }
 0x6f1   :  { %v700_v9 = vpop.f32.mrb[4].mxu1 }
 0x6f2   :  { %v2066_v17 = vpop.f32.mrb[5].mxu1 }
 0x6f3   :  { %v704_v19 = vpop.f32.mrb[6].mxu1 }
 0x6f4   :  { %v709_v21 = vpack.c.bf16 %v704_v19, %v700_v9  ;;  %v2068_v22 = vpop.f32.mrb[7].mxu1 }
 0x6f6   :  { %1642 = vmatmul.mubr.bf16.vlgmr.msra.gmra.mrb[20].mxu0 %v709_v21  ;;  %1657 = vmatprep.subr.bf16.mxu0 %v709_v21 }
 0x6f7   :  { %1658 = vmatpush3.bf16.msra.mxu0 %v709_v21  ;;  %1659 = vmatprep.mubr.msk.bf16.mxu0 %vm103_vm0, %v1981_v8 }
 0x6fe   :  { %1660 = vmatmul.mubr.msk.bf16.vlgmr.msra.gmra.mrb[24].mxu0 %vm103_vm0, %v1983_v10 }
 0x6ff   :  { %1663 = vmatprep.mubr.msk.bf16.mxu0 %vm103_vm0, %v1989_v12 }
 0x706   :  { %1664 = vmatmul.mubr.msk.bf16.gmra.mrb[28].mxu0 %vm103_vm0, %v1993_v13 }
 0x707   :  { %1683 = vmatprep.mubr.msk.f32.mxu0 %vm1855_vm1, %v1854_v1 }
 0x7c9   :  { %v792_v11 = vpop.f32.mrb[20].mxu0 }
 0x7ca   :  { %v799_v16 = vmul.f32 %v792_v11, %v59_v28  ;;  %v1643_v18 = vpop.f32.mrb[21].mxu0 }
 0x7cb   :  { %v795_v4 = vpop.f32.mrb[22].mxu0 }
 0x7cc   :  { %v800_v8 = vmul.f32 %v795_v4, %v60_v29  ;;  %v1644_v32 = vpop.f32.mrb[23].mxu0  ;;  %v801_v10 = vsel %vm242_vm4, %v799_v16, 0.0 }
 0x7ce   :  { %v802_v12 = vsel %vm242_vm4, %v800_v8, 0.0 }
 0x7cf   :  { %v803_v5 = vadd.f32 %v802_v12, %v801_v10 }
 0x7d1   :  { %v804_v34 = vrot.slane %v803_v5, 4  ;;  %v1661_v6 = vpop.f32.mrb[24].mxu0 }
 0x7d2   :  { %v963_v7 = vmul.f32 %v1661_v6, %v43_v25  ;;  %v930_v14 = vpop.f32.mrb[25].mxu0 }
 0x7d3   :  { %v805_v13 = vadd.f32 %v804_v34, %v803_v5  ;;  %v961_v15 = vmul.f32 %v930_v14, %v41_v30  ;;  %v1662_v20 = vpop.f32.mrb[26].mxu0 }
 0x7d4   :  { %v964_v23 = vmul.f32 %v1662_v20, %v44_v31  ;;  %v933_v9 = vpop.f32.mrb[27].mxu0 }
 0x7d5   :  { %v806_v35 = vrot.slane %v805_v13, 2  ;;  %v962_v19 = vmul.f32 %v933_v9, %v42_v33 }
 0x7d7   :  { %v807_v36 = vadd.f32 %v806_v35, %v805_v13  ;;  %v969_v25 = vpack.c.bf16 %v962_v19, %v961_v15 }
 0x7d9   :  { %v808_v37 = vrot.slane %v807_v36, 1  ;;  %v1665_v21 = vpop.f32.mrb[28].mxu0 }
 0x7da   :  { %v967_v16 = vmul.f32 %v1665_v21, %v47_v44  ;;  %v946_v18 = vpop.f32.mrb[29].mxu0 }
 0x7db   :  { %v809_v38 = vadd.f32 %v808_v37, %v807_v36  ;;  %v965_v24 = vmul.f32 %v946_v18, %v45_v46  ;;  %v1666_v30 = vpop.f32.mrb[30].mxu0 }
 0x7dc   :  { %v968_v31 = vmul.f32 %v1666_v30, %v48_v47  ;;  %v949_v8 = vpop.f32.mrb[31].mxu0  ;;  %v1498_v30 = vld [vmem:[%s2197_s2 + $0x68] ss:$0 sm:$0xff] }
 0x7dd   :  { %811 = vrot.lane.b32.xlu1 %v809_v38, %s1857_s29  ;;  %v966_v33 = vmul.f32 %v949_v8, %v46_v50  ;;  %v1496_v50 = vld [vmem:[%s2197_s2 + $0x78] ss:$0 sm:$0xff] }
 0x7de   :  { %v972_v44 = vpack.c.bf16 %v968_v31, %v967_v16 }
 0x7df   :  { %v971_v32 = vpack.c.bf16 %v966_v33, %v965_v24 }
 0x84f   :  { %v812_v28 = vpop.permute.xlu1 %811 }
 0x850   :  { %v814_v39 = vadd.f32 %v812_v28, %v792_v11  ;;  %v815_v40 = vadd.f32 %v812_v28, %v795_v4  ;;  %v970_v11 = vpack.c.bf16 %v964_v23, %v963_v7 }
 0x852   :  { %v818_v41 = vmul.f32 0.2, %v814_v39  ;;  %v819_v27 = vmul.f32 0.2, %v815_v40  ;;  %vm817_vm14 = vcmp.gt.f32.partialorder %v815_v40, 0.0  ;;  %vm816_vm15 = vcmp.gt.f32.partialorder %v814_v39, 0.0 }
 0x854   :  { %v821_v29 = vsel %vm817_vm14, %v815_v40, %v819_v27  ;;  %v820_v42 = vsel %vm816_vm15, %v814_v39, %v818_v41  ;;  %v1194_v39 = vld [vmem:[%s2197_s2 + $0x20] sm:$0xff]  ;;  %v1859_v41 = vmov 0.0|0.0   ;;  %v1197_v27 = vld [vmem:[%s2197_s2 + $0x38] sm:$0xff] }
 0x855   :  { %v823_v49 = vsel %vm279_vm7, %v821_v29, -1e+30  ;;  %v822_v51 = vsel %vm278_vm11, %v820_v42, -1e+30  ;;  %1715 = vmatprep.subr.bf16.mxu0 %v1859_v41 }
 0x856   :  { %v827_v52 = vsel %vm282_vm10, %v823_v49, -inf  ;;  %v824_v53 = vsel %vm282_vm10, %v822_v51, -inf }
 0x857   :  { %828 = vmax.xlane.f32.xlu1 %v827_v52  ;;  %825 = vmax.xlane.f32.xlu0 %v824_v53 }
 0x8e4   :  { %v829_v55 = vpop.xlane.xlu1 %828  ;;  %v826_v56 = vpop.xlane.xlu0 %825 }
 0x8e5   :  { %v831_v57 = vsub.f32 %v823_v49, %v829_v55  ;;  %v830_v58 = vsub.f32 %v822_v51, %v826_v56 }
 0x8e7   :  { %v834_v59 = vmul.f32 1.442695, %v831_v57  ;;  %v832_v60 = vmul.f32 1.442695, %v830_v58 }
 0x8e9   :  { %1810 = vpow2.f32 %v834_v59 }
 0x8ea   :  { %1812 = vpow2.f32 %v832_v60 }
 0x8f3   :  { %v1811_v61 = vpop.eup %1810 }
 0x8f4   :  { %v1813_v48 = vpop.eup %1812 }
 0x8f5   :  { %v836_v62 = vpack.c.bf16 %v1811_v61, %v1813_v48 }
 0x8f7   :  { %838 = vrot.lane.b32.xlu0 %v836_v62, %s1857_s29 }
 0x969   :  { %v839_v54 = vpop.permute.xlu0 %838 }
 0x96a   :  { %1654 = vmatmul.mubr.msk.bf16.vlgmr.msra.gmra.mrb[8].mxu1 %vm242_vm4, %v839_v54 }
 0x96b   :  { %1675 = vmatprep.mubr.msk.bf16.mxu1 %vm1855_vm1, %v1854_v1  ;;  %1668 = vmatpush3.bf16.msra.mxu1 %v969_v25 }
 0x96c   :  { %1669 = vmatprep.subr.bf16.mxu1 %v1854_v1 }
 0x96f   :  { %1670 = vmatpush3.bf16.msra.mxu1 %v970_v11 }
 0x970   :  { %1671 = vmatprep.subr.bf16.mxu1 %v1854_v1 }
 0x973   :  { %1672 = vmatpush3.bf16.msra.mxu1 %v971_v32 }
 0x974   :  { %1673 = vmatprep.subr.bf16.mxu1 %v1854_v1 }
 0x977   :  { %1674 = vmatpush3.bf16.msra.mxu1 %v972_v44 }
 0x978   :  { %1718 = vmatprep.subr.bf16.mxu1 %v1859_v41 }
 0xa3d   :  { %v877_v63 = vpop.f32.mrb[8].mxu1 }
 0xa3e   :  { %1814 = vrcp.f32 %v877_v63  ;;  %v1655_v0 = vpop.f32.mrb[9].mxu1 }
 0xa3f   :  { %v880_v2 = vpop.f32.mrb[10].mxu1 }
 0xa40   :  { %1816 = vrcp.f32 %v880_v2  ;;  %v1656_v3 = vpop.f32.mrb[11].mxu1 }
 0xa48   :  { %v1815_v4 = vpop.eup %1814 }
 0xa49   :  { %888 = vrot.lane.b32.xlu1 %v1815_v4, %s1857_s29 }
 0xa4a   :  { %v1817_v26 = vpop.eup %1816 }
 0xa4b   :  { %890 = vrot.lane.b32.xlu0 %v1817_v26, %s1857_s29 }
 0xabb   :  { %v889_v43 = vpop.permute.xlu1 %888 }
 0xabc   :  { %v894_v47 = vmul.f32 %v1813_v48, %v889_v43 }
 0xabd   :  { %v891_v46 = vpop.permute.xlu0 %890 }
 0xabe   :  { %v895_v10 = vmul.f32 %v1811_v61, %v891_v46  ;;  %v1497_v61 = vld [vmem:[%s2197_s2 + $0x60] ss:$0 sm:$0xff] }
 0xac0   :  { %v973_v12 = vpack.c.bf16 %v895_v10, %v894_v47 }
 0xac2   :  { %975 = vrot.lane.b32.xlu1 %v973_v12, %s1857_s29 }
 0xb34   :  { %v976_v45 = vpop.permute.xlu1 %975 }
 0xb35   :  { %1676 = vmatmul.mubr.msk.bf16.vlgmr.msra.gmra.mrb[12].mxu1 %vm242_vm4, %v976_v45 }
 0xb36   :  { %1694 = vmatprep.mubr.msk.f32.mxu1 %vm1855_vm1, %v1854_v1 }
 0xc08   :  { %v1014_v5 = vpop.f32.mrb[12].mxu1 }
 0xc09   :  { %v1015_v34 = vadd.f32 %v1014_v5, %v2066_v17  ;;  %v1677_v13 = vpop.f32.mrb[13].mxu1  ;;  %v1195_v17 = vld [vmem:[%s2197_s2 + $0x28] sm:$0xff] }
 0xc0a   :  { %v1017_v35 = vpop.f32.mrb[14].mxu1  ;;  %v1719_v40 = vpack.c.bf16 %v1195_v17, %v1194_v39  ;;  %v1088_v39 = vld [vmem:[%s2197_s2 + $0x80] sm:$0x3] }
 0xc0b   :  { %v1025_v36 = vadd.f32 %v1496_v50, %v1015_v34  ;;  %v1018_v37 = vadd.f32 %v1017_v35, %v2068_v22  ;;  %v1678_v38 = vpop.f32.mrb[15].mxu1  ;;  %v1196_v22 = vld [vmem:[%s2197_s2 + $0x30] sm:$0xff] }
 0xc0c   :  { %1720 = vmatpush3.bf16.msra.mxu1 %v1719_v40  ;;  %v1722_v29 = vpack.c.bf16 %v1197_v27, %v1196_v22  ;;  %v1191_v38 = vld [vmem:[%s2197_s2 + $0x8] sm:$0xff]  ;;  %v1192_v40 = vld [vmem:[%s2197_s2 + $0x10] sm:$0xff]  ;;  %v1193_v22 = vld [vmem:[%s2197_s2 + $0x18] sm:$0xff] }
 0xc0d   :  { %v1026_v28 = vadd.f32 %v1496_v50, %v1018_v37  ;;  %1029 = vrot.lane.b32.xlu0 %v1025_v36, %s1858_s7  ;;  %1721 = vmatprep.subr.bf16.mxu1 %v1859_v41  ;;  %v1190_v37 = vld [vmem:[%s2197_s2] sm:$0xff]  ;;  %v1728_v27 = vpack.c.bf16 %v1193_v22, %v1192_v40 }
 0xc0e   :  { %v1725_v17 = vpack.c.bf16 %v1191_v38, %v1190_v37 }
 0xc0f   :  { %1031 = vrot.lane.b32.xlu1 %v1026_v28, %s1858_s7 }
 0xc10   :  { %1723 = vmatpush3.bf16.msra.mxu1 %v1722_v29 }
 0xc11   :  { %1037 = vrot.lane.b32.xlu0 %v1025_v36, %s1857_s29  ;;  %1730 = vmatprep.subr.bf16.mxu1 %v1859_v41 }
 0xc13   :  { %1039 = vrot.lane.b32.xlu1 %v1026_v28, %s1857_s29 }
 0xc15   :  { %1045 = vrot.lane.b32.xlu0 %v1025_v36, %s1860_s12 }
 0xc17   :  { %1047 = vrot.lane.b32.xlu1 %v1026_v28, %s1860_s12 }
 0xc7f   :  { %v1030_v42 = vpop.permute.xlu0 %1029 }
 0xc80   :  { %v1035_v52 = vadd.f32 %v1030_v42, %v1025_v36 }
 0xc81   :  { %v1032_v49 = vpop.permute.xlu1 %1031 }
 0xc82   :  { %v1036_v55 = vadd.f32 %v1032_v49, %v1026_v28  ;;  %v1351_v49 = vld [vmem:[%s2197_s2 + $0x40] sm:$0xff] }
 0xc83   :  { %v1038_v51 = vpop.permute.xlu0 %1037 }
 0xc84   :  { %v1043_v56 = vadd.f32 %v1038_v51, %v1035_v52  ;;  %v1352_v51 = vld [vmem:[%s2197_s2 + $0x48] sm:$0xff] }
 0xc85   :  { %v1040_v53 = vpop.permute.xlu1 %1039  ;;  %v1731_v52 = vpack.c.bf16 %v1352_v51, %v1351_v49 }
 0xc86   :  { %v1044_v58 = vadd.f32 %v1040_v53, %v1036_v55 }
 0xc87   :  { %v1046_v57 = vpop.permute.xlu0 %1045 }
 0xc88   :  { %v1051_v59 = vadd.f32 %v1046_v57, %v1043_v56 }
 0xc89   :  { %v1048_v60 = vpop.permute.xlu1 %1047 }
 0xc8a   :  { %v1053_v48 = vmul.f32 0.25, %v1051_v59  ;;  %v1052_v62 = vadd.f32 %v1048_v60, %v1044_v58  ;;  %v1505_v58 = vld [vmem:[%s2197_s2 + $0x58] ss:$0 sm:$0xff] }
 0xc8c   :  { %v1174_v54 = vsel %vm1063_vm2, %v1053_v48, -inf  ;;  %v1054_v63 = vmul.f32 0.25, %v1052_v62  ;;  %v1061_v0 = vmul.f32 %v1497_v61, %v1053_v48 }
 0xc8d   :  { %v1175_v2 = vrot.slane %v1174_v54, 4 }
 0xc8e   :  { %v1181_v3 = vsel %vm1063_vm2, %v1054_v63, -inf  ;;  %v1064_v6 = vsel %vm1063_vm2, %v1061_v0, 0.0  ;;  %v1062_v7 = vmul.f32 %v1497_v61, %v1054_v63 }
 0xc8f   :  { %v1176_v14 = vmax.f32 %v1174_v54, %v1175_v2  ;;  %v1182_v15 = vrot.slane %v1181_v3, 4  ;;  %1065 = vadd.xlane.f32.xlu0 %v1064_v6 }
 0xc90   :  { %v1067_v20 = vsel %vm1063_vm2, %v1062_v7, 0.0 }
 0xc91   :  { %v1177_v23 = vrot.slane %v1176_v14, 2  ;;  %v1183_v9 = vmax.f32 %v1181_v3, %v1182_v15  ;;  %1068 = vadd.xlane.f32.xlu1 %v1067_v20 }
 0xc93   :  { %v1178_v19 = vmax.f32 %v1176_v14, %v1177_v23  ;;  %v1184_v21 = vrot.slane %v1183_v9, 2 }
 0xc95   :  { %v1179_v11 = vrot.slane %v1178_v19, 1  ;;  %v1185_v16 = vmax.f32 %v1183_v9, %v1184_v21 }
 0xc97   :  { %v1186_v18 = vrot.slane %v1185_v16, 1  ;;  %v1180_v4 = vmax.f32 %v1178_v19, %v1179_v11 }
 0xc99   :  { %v1187_v25 = vmax.f32 %v1185_v16, %v1186_v18 }
 0xc9b   :  { %v1189_v24 = vsel %vm1188_vm3, %v1180_v4, %v1187_v25 }
 0xc9c   :  { %1695 = vmatmul.mubr.msk.f32.vlgmr.msra.gmra.mrb[16].mxu1 %vm1063_vm2, %v1189_v24 }
 0xc9d   :  { %1712 = vmatprep.mubr.msk.f32.mxu1 %vm1855_vm1, %v1854_v1  ;;  %1732 = vmatpush3.bf16.msra.mxu1 %v1731_v52 }
 0xd1c   :  { %v1066_v31 = vpop.xlane.xlu0 %1065 }
 0xd1d   :  { %v1074_v8 = vadd.f32 %v1498_v30, %v1066_v31 }
 0xd1e   :  { %v1069_v26 = vpop.xlane.xlu1 %1068 }
 0xd1f   :  { %v1499_v33 = vmul.f32 -1.442695, %v1074_v8  ;;  %v1075_v44 = vadd.f32 %v1498_v30, %v1069_v26 }
 0xd21   :  { %1818 = vpow2.f32 %v1499_v33  ;;  %v1500_v32 = vmul.f32 -1.442695, %v1075_v44 }
 0xd23   :  { %1820 = vpow2.f32 %v1500_v32 }
 0xd2b   :  { %v1819_v43 = vpop.eup %1818 }
 0xd2c   :  { %v1082_v46 = vadd.f32 1.0, %v1819_v43 }
 0xd2d   :  { %v1821_v47 = vpop.eup %1820 }
 0xd2e   :  { %1822 = vrcp.f32 %v1082_v46  ;;  %v1083_v10 = vadd.f32 1.0, %v1821_v47 }
 0xd30   :  { %1824 = vrcp.f32 %v1083_v10 }
 0xd38   :  { %v1823_v12 = vpop.eup %1822 }
 0xd39   :  { %1091 = vperm.xlu0 %1744, %v1823_v12  }
 0xd3a   :  { %v1825_v45 = vpop.eup %1824 }
 0xd3b   :  { %1096 = vperm.xlu1 %1745, %v1825_v45  }
 0xd6f   :  { %v1268_v50 = vpop.f32.mrb[16].mxu1 }
 0xd70   :  { %v1696_v5 = vpop.f32.mrb[17].mxu1 }
 0xdb8   :  { %v1092_v34 = vpop.permute.xlu0 %1091 }
 0xdb9   :  { %v1099_v35 = vmul.f32 %v1092_v34, %v1053_v48 }
 0xdba   :  { %v1097_v13 = vpop.permute.xlu1 %1096 }
 0xdbb   :  { %v1100_v36 = vmul.f32 %v1097_v13, %v1054_v63 }
 0xdbd   :  { %v1716_v28 = vpack.c.bf16 %v1100_v36, %v1099_v35 }
 0xdbf   :  { %1717 = vmatpush3.bf16.msra.mxu0 %v1716_v28 }
 0xdc0   :  { %1724 = vmatprep.subr.bf16.mxu0 %v1859_v41 }
 0xdc2   :  { %1684 = vmatmul.mubr.msk.f32.vlgmr.msra.gmra.mrb[32].mxu0 %vm103_vm0, %v1088_v39 }
 0xdc3   :  { %1726 = vmatpush3.bf16.msra.mxu0 %v1725_v17  ;;  %1705 = vmatprep.mubr.msk.f32.mxu0 %vm1855_vm1, %v1854_v1  ;;  %v1504_v1 = vld [vmem:[%s2197_s2 + $0x50] ss:$0 sm:$0xff] }
 0xdc4   :  { %1727 = vmatprep.subr.bf16.mxu0 %v1859_v41 }
 0xdc7   :  { %1729 = vmatpush3.bf16.msra.mxu0 %v1728_v27 }
 0xe95   :  { %v1170_v29 = vpop.f32.mrb[32].mxu0 }
 0xe96   :  { %1706 = vmatmul.mubr.msk.f32.vlgmr.msra.gmra.mrb[34].mxu0 %vm1063_vm2, %v1170_v29  ;;  %v1685_v42 = vpop.f32.mrb[33].mxu0 }
 0xf69   :  { %v1341_v41 = vpop.f32.mrb[34].mxu0 }
 0xf6a   :  { %v1342_v53 = vadd.f32 %v1341_v41, %v1268_v50  ;;  %v1707_v55 = vpop.f32.mrb[35].mxu0 }
 0xf6c   :  { %v1349_v56 = vadd.f32 %v1504_v1, %v1342_v53 }
 0xf6e   :  { %v1350_v57 = vmax.f32 %v1349_v56, 0.0 }
 0xf70   :  { %1713 = vmatmul.mubr.msk.f32.vlgmr.msra.gmra.mrb[18].mxu1 %vm103_vm0, %v1350_v57 }
0x1043   :  { %v1427_v59 = vpop.f32.mrb[18].mxu1 }
0x1044   :  { %v1428_v60 = vadd.f32 %v1505_v58, %v1427_v59  ;;  %v1714_v61 = vpop.f32.mrb[19].mxu1 }
0x1046   :  { %1431 = vst [vmem:[%s2198_s3] sm:$0x3] %v1428_v60 }
0x1047   :  { %1436 = vsyncpa [#allocation3], 1 }

</bundles_post_ra>
